<compile_context>
chip_gen: v7x
topology: tpu7x:2x2x1
jax: 0.10.0
libtpu: 0.0.40
codegen_flags: <defaults>
</compile_context>

<pallas_src>
import functools
import math

import jax
import jax.numpy as jnp
from jax.experimental import pallas as pl
from jax.experimental.pallas import tpu as pltpu

LN_EPS = 1e-5
LRELU_SLOPE = 0.02      # matches nn.LeakyReLU(0.02)
NEG_BIG = -1e30         # logit value for padded softmax columns


def _round_up(x, m):
    return ((x + m - 1) // m) * m


# ---------------------------------------------------------------------------
# Fused kernel
# ---------------------------------------------------------------------------
def _block_fwd(h, w_ref, b_ref, g_ref, beta_ref):
    """Linear (bf16 MXU, f32 accumulate) -> LayerNorm -> LeakyReLU(0.02)."""
    y = jnp.dot(h.astype(jnp.bfloat16), w_ref[...],
                preferred_element_type=jnp.float32) + b_ref[...]
    mean = jnp.mean(y, axis=-1, keepdims=True)
    var = jnp.mean((y - mean) * (y - mean), axis=-1, keepdims=True)
    yn = (y - mean) * jax.lax.rsqrt(var + LN_EPS)
    yn = yn * g_ref[...] + beta_ref[...]
    return jnp.where(yn >= 0.0, yn, LRELU_SLOPE * yn)


def _make_fused_kernel(n_enc, n_dec, lat_pad):
    """Builds the fused VAE forward kernel for a given layer count / latent pad."""

    def kernel(*refs):
        it = iter(refs)
        x_ref = next(it)                                  # (tb, c_in)          f32
        eps_ref = next(it)                                # (tb, lat_pad)       f32 (zero-padded)
        enc = [tuple(next(it) for _ in range(4)) for _ in range(n_enc)]
        w_ml_ref = next(it)                               # (h_last, 2*lat_pad) bf16  [W_mu|W_logvar]
        b_ml_ref = next(it)                               # (1, 2*lat_pad)      f32
        dec = [tuple(next(it) for _ in range(4)) for _ in range(n_dec)]
        w_out_ref = next(it)                              # (hls[0], c_pad)     bf16
        b_out_ref = next(it)                              # (1, c_pad)          f32 (pad cols = NEG_BIG)
        lat_ref = next(it)                                # out: (tb, 3*lat_pad) [mu|logvar|z]
        xr_ref = next(it)                                 # out: (tb, c_pad)

        # ---- encoder ----
        h = x_ref[...]
        for blk in enc:
            h = _block_fwd(h, *blk)

        # ---- fused, lane-padded mu / logvar heads (128-aligned split is free) ----
        ml = jnp.dot(h.astype(jnp.bfloat16), w_ml_ref[...],
                     preferred_element_type=jnp.float32) + b_ml_ref[...]
        mu = ml[:, :lat_pad]
        logvar = ml[:, lat_pad:]

        # ---- reparameterization: z = mu + exp(0.5*logvar)*eps (padded cols stay 0) ----
        z = mu + jnp.exp(0.5 * logvar) * eps_ref[...]

        # Single lane-dense output slab for all three latent tensors.
        lat_ref[:, 0 * lat_pad:1 * lat_pad] = mu
        lat_ref[:, 1 * lat_pad:2 * lat_pad] = logvar
        lat_ref[:, 2 * lat_pad:3 * lat_pad] = z

        # ---- decoder (first weight is row-padded to lat_pad; padded z cols are 0) ----
        d = z
        for blk in dec:
            d = _block_fwd(d, *blk)

        # ---- final Linear -> exact Softmax (padded logits ~ -1e30 -> exp == 0) ----
        y = jnp.dot(d.astype(jnp.bfloat16), w_out_ref[...],
                    preferred_element_type=jnp.float32) + b_out_ref[...]
        m = jnp.max(y, axis=-1, keepdims=True)
        e = jnp.exp(y - m)
        xr_ref[...] = e / jnp.sum(e, axis=-1, keepdims=True)

    return kernel


# ---------------------------------------------------------------------------
# Forward pass (single fused pallas_call with a batch grid)
# ---------------------------------------------------------------------------
@functools.partial(jax.jit, static_argnames=("batch_tile",))
def vae_forward(params, x, eps, *, batch_tile=None):
    B, c_in = x.shape
    lat_dim = eps.shape[1]
    n_enc = len(params["encoder"])
    n_dec = len(params["decoder"])

    lat_pad = _round_up(max(lat_dim, 1), 128)   # lane-dense latent width
    c_pad = _round_up(c_in, 128)                # lane-dense reconstruction width

    # ---- batch tile: big enough to fill the MXU, >=2 grid steps when possible ----
    if batch_tile is None:
        tb = 256 if B > 512 else max(128, _round_up(pl.cdiv(B, 2), 8))
    else:
        tb = int(batch_tile)
    tb = max(8, _round_up(min(tb, _round_up(B, 8)), 8))
    grid = (pl.cdiv(B, tb),)   # ragged last tile handled by Pallas (no jnp.pad of x/eps rows)

    # ---- parameter repacking (padding + bf16 weights) ----
    def pad_cols(a, n):
        return jnp.pad(a, ((0, 0), (0, n - a.shape[1]))) if a.shape[1] != n else a

    # Fused mu/logvar head: [W_mu | 0 | W_logvar | 0] -> (h_last, 2*lat_pad)
    w_ml = jnp.concatenate([pad_cols(params["mu"]["w"], lat_pad),
                            pad_cols(params["logvar"]["w"], lat_pad)],
                           axis=1).astype(jnp.bfloat16)
    b_ml = jnp.concatenate([pad_cols(params["mu"]["b"], lat_pad),
                            pad_cols(params["logvar"]["b"], lat_pad)], axis=1)

    # eps zero-padded to lat_pad lanes (small; keeps the latent path lane-dense).
    eps_p = pad_cols(eps, lat_pad)

    # Decoder first layer: pad input rows so it consumes the lane-padded z.
    dec_blocks = [dict(blk) for blk in params["decoder"]]
    w0 = dec_blocks[0]["w"]
    if w0.shape[0] != lat_pad:
        dec_blocks[0]["w"] = jnp.pad(w0, ((0, lat_pad - w0.shape[0]), (0, 0)))

    # Final layer: pad output columns to a multiple of 128; padded logits get a
    # very negative bias so they vanish from the softmax max/sum.
    w_out = pad_cols(params["decoder_out"]["w"], c_pad).astype(jnp.bfloat16)
    b_out = params["decoder_out"]["b"]
    if c_pad != c_in:
        b_out = jnp.concatenate(
            [b_out, jnp.full((1, c_pad - c_in), NEG_BIG, jnp.float32)], axis=1)

    # ---- BlockSpecs ----
    def act_spec(ncols):
        # Activation-like arrays: tiled along the batch grid axis.
        return pl.BlockSpec((tb, ncols), lambda i: (i, 0))

    def resident(arr):
        # Constant index_map -> fetched once, stays VMEM-resident across grid steps.
        return pl.BlockSpec(arr.shape, lambda i: (0, 0))

    inputs = [x, eps_p]
    in_specs = [act_spec(c_in), act_spec(lat_pad)]
    mm_dims = []

    def add_block(blk):
        w = blk["w"].astype(jnp.bfloat16)
        mm_dims.append(w.shape)
        for a in (w, blk["b"], blk["gamma"], blk["beta"]):
            inputs.append(a)
            in_specs.append(resident(a))

    for blk in params["encoder"]:
        add_block(blk)
    inputs += [w_ml, b_ml]
    in_specs += [resident(w_ml), resident(b_ml)]
    mm_dims.append(w_ml.shape)
    for blk in dec_blocks:
        add_block(blk)
    inputs += [w_out, b_out]
    in_specs += [resident(w_out), resident(b_out)]
    mm_dims.append(w_out.shape)

    out_shape = (
        jax.ShapeDtypeStruct((B, 3 * lat_pad), jnp.float32),   # [mu | logvar | z]
        jax.ShapeDtypeStruct((B, c_pad), jnp.float32),         # x_recon (lane-padded)
    )
    out_specs = (act_spec(3 * lat_pad), act_spec(c_pad))

    # ---- advisory cost estimate ----
    flops = int(sum(2 * B * k * n for (k, n) in mm_dims))
    transcendentals = int(B * (lat_pad + c_pad + 2 * (n_enc + n_dec)))
    in_bytes = sum(int(a.size) * a.dtype.itemsize for a in inputs)
    out_bytes = sum(math.prod(s.shape) * 4 for s in out_shape)
    cost = pl.CostEstimate(flops=flops, transcendentals=transcendentals,
                           bytes_accessed=int(in_bytes + out_bytes))

    # ---- VMEM budget: 2x buffered tiles + resident weights + intermediates ----
    weight_bytes = sum(int(a.size) * a.dtype.itemsize for a in inputs[2:])
    tile_bytes = 4 * tb * (c_in + lat_pad + 3 * lat_pad + c_pad)
    widths = [n for (_, n) in mm_dims]
    interm_bytes = 4 * tb * (sum(widths) + max(widths))
    vmem_limit = int(min(max(2 * weight_bytes + 2 * tile_bytes + interm_bytes + (8 << 20),
                             32 << 20), 56 << 20))

    latents, xr = pl.pallas_call(
        _make_fused_kernel(n_enc, n_dec, lat_pad),
        grid=grid,
        in_specs=in_specs,
        out_specs=out_specs,
        out_shape=out_shape,
        compiler_params=pltpu.CompilerParams(
            dimension_semantics=("parallel",),
            vmem_limit_bytes=vmem_limit),
        cost_estimate=cost,
    )(*inputs)

    mu = latents[:, 0 * lat_pad:0 * lat_pad + lat_dim]
    logvar = latents[:, 1 * lat_pad:1 * lat_pad + lat_dim]
    z = latents[:, 2 * lat_pad:2 * lat_pad + lat_dim]
    x_recon = xr[:, :c_in] if c_pad != c_in else xr
    return mu, logvar, z, x_recon


# ---------------------------------------------------------------------------
# Parameter construction (deterministic, mimics PyTorch default uniform init)
# ---------------------------------------------------------------------------
def _init_linear(key, fan_in, fan_out):
    kw, kb = jax.random.split(key)
    bound = 1.0 / jnp.sqrt(jnp.float32(fan_in))
    w = jax.random.uniform(kw, (fan_in, fan_out), jnp.float32, -bound, bound)
    b = jax.random.uniform(kb, (1, fan_out), jnp.float32, -bound, bound)
    return w, b


def _init_block(key, fan_in, fan_out):
    w, b = _init_linear(key, fan_in, fan_out)
    return dict(
        w=w, b=b,
        gamma=jnp.ones((1, fan_out), jnp.float32),
        beta=jnp.zeros((1, fan_out), jnp.float32),
    )


def init_vae_params(key, in_channel, lat_dim=2, hls=(512, 256, 128)):
    keys = jax.random.split(key, 2 * len(hls) + 4)
    k = iter(keys)
    params = {"encoder": [], "decoder": []}

    dims = (in_channel,) + tuple(hls)
    for i in range(len(hls)):
        params["encoder"].append(_init_block(next(k), dims[i], dims[i + 1]))

    params["mu"] = dict(zip(("w", "b"), _init_linear(next(k), hls[-1], lat_dim)))
    params["logvar"] = dict(zip(("w", "b"), _init_linear(next(k), hls[-1], lat_dim)))

    ddims = (lat_dim,) + tuple(reversed(hls))
    for i in range(len(hls)):
        params["decoder"].append(_init_block(next(k), ddims[i], ddims[i + 1]))
    params["decoder_out"] = dict(
        zip(("w", "b"), _init_linear(next(k), hls[0], in_channel))
    )
    return params


# ---------------------------------------------------------------------------
# Pure-JAX reference (mirrors the kernel's bf16-matmul / f32-elsewhere math)
# ---------------------------------------------------------------------------
def vae_forward_ref(params, x, eps):
    def mm(a, w):
        return jnp.dot(a.astype(jnp.bfloat16), w.astype(jnp.bfloat16),
                       preferred_element_type=jnp.float32)

    def block(h, blk):
        y = mm(h, blk["w"]) + blk["b"]
        mean = jnp.mean(y, axis=-1, keepdims=True)
        var = jnp.mean((y - mean) ** 2, axis=-1, keepdims=True)
        yn = (y - mean) / jnp.sqrt(var + LN_EPS) * blk["gamma"] + blk["beta"]
        return jnp.where(yn >= 0.0, yn, LRELU_SLOPE * yn)

    h = x
    for blk in params["encoder"]:
        h = block(h, blk)
    mu = mm(h, params["mu"]["w"]) + params["mu"]["b"]
    logvar = mm(h, params["logvar"]["w"]) + params["logvar"]["b"]
    z = mu + jnp.exp(0.5 * logvar) * eps
    d = z
    for blk in params["decoder"]:
        d = block(d, blk)
    y = mm(d, params["decoder_out"]["w"]) + params["decoder_out"]["b"]
    return mu, logvar, z, jax.nn.softmax(y, axis=-1)


# ---------------------------------------------------------------------------
# Main
# ---------------------------------------------------------------------------
if __name__ == "__main__":
    # Small shapes consistent with the module (scaled-down hidden sizes).
    batch = 32
    in_channel = 32
    lat_dim = 2
    hls = (128, 64, 32)

    key = jax.random.PRNGKey(0)
    kp, kx, ke = jax.random.split(key, 3)

    params = init_vae_params(kp, in_channel, lat_dim, hls)
    x = jax.random.normal(kx, (batch, in_channel), jnp.float32)
    # TODO(synk): torch.randn noise inside reparameterize() has no bit-exact JAX
    # equivalent; the N(0,1) noise is sampled here with jax.random and passed in.
    eps = jax.random.normal(ke, (batch, lat_dim), jnp.float32)

    # batch_tile=16 keeps shapes tiny while exercising a 2-step batch grid.
    mu, logvar, z, x_recon = vae_forward(params, x, eps, batch_tile=16)
    jax.block_until_ready((mu, logvar, z, x_recon))

    # Shape checks.
    assert mu.shape == (batch, lat_dim)
    assert logvar.shape == (batch, lat_dim)
    assert z.shape == (batch, lat_dim)
    assert x_recon.shape == (batch, in_channel)

    # Numerical check against the matching pure-JAX reference.
    mu_r, logvar_r, z_r, xr_r = vae_forward_ref(params, x, eps)
    assert jnp.allclose(mu, mu_r, atol=2e-2, rtol=2e-2)
    assert jnp.allclose(logvar, logvar_r, atol=2e-2, rtol=2e-2)
    assert jnp.allclose(z, z_r, atol=2e-2, rtol=2e-2)
    assert jnp.allclose(x_recon, xr_r, atol=5e-3, rtol=5e-3)
    # Exact softmax division -> rows sum to 1 tightly.
    assert jnp.allclose(jnp.sum(x_recon, axis=-1), 1.0, atol=1e-3)

    print("KERNEL_OK")
</pallas_src>

<mosaic_0001>
module attributes {stable_mosaic.version = 11 : i64} {
  func.func @kernel(%arg0: i32, %arg1: memref<16x32xf32, #tpu.memory_space<vmem>>, %arg2: memref<16x128xf32, #tpu.memory_space<vmem>>, %arg3: memref<32x128xbf16, #tpu.memory_space<vmem>>, %arg4: memref<1x128xf32, #tpu.memory_space<vmem>>, %arg5: memref<1x128xf32, #tpu.memory_space<vmem>>, %arg6: memref<1x128xf32, #tpu.memory_space<vmem>>, %arg7: memref<128x64xbf16, #tpu.memory_space<vmem>>, %arg8: memref<1x64xf32, #tpu.memory_space<vmem>>, %arg9: memref<1x64xf32, #tpu.memory_space<vmem>>, %arg10: memref<1x64xf32, #tpu.memory_space<vmem>>, %arg11: memref<64x32xbf16, #tpu.memory_space<vmem>>, %arg12: memref<1x32xf32, #tpu.memory_space<vmem>>, %arg13: memref<1x32xf32, #tpu.memory_space<vmem>>, %arg14: memref<1x32xf32, #tpu.memory_space<vmem>>, %arg15: memref<32x256xbf16, #tpu.memory_space<vmem>>, %arg16: memref<1x256xf32, #tpu.memory_space<vmem>>, %arg17: memref<128x32xbf16, #tpu.memory_space<vmem>>, %arg18: memref<1x32xf32, #tpu.memory_space<vmem>>, %arg19: memref<1x32xf32, #tpu.memory_space<vmem>>, %arg20: memref<1x32xf32, #tpu.memory_space<vmem>>, %arg21: memref<32x64xbf16, #tpu.memory_space<vmem>>, %arg22: memref<1x64xf32, #tpu.memory_space<vmem>>, %arg23: memref<1x64xf32, #tpu.memory_space<vmem>>, %arg24: memref<1x64xf32, #tpu.memory_space<vmem>>, %arg25: memref<64x128xbf16, #tpu.memory_space<vmem>>, %arg26: memref<1x128xf32, #tpu.memory_space<vmem>>, %arg27: memref<1x128xf32, #tpu.memory_space<vmem>>, %arg28: memref<1x128xf32, #tpu.memory_space<vmem>>, %arg29: memref<128x128xbf16, #tpu.memory_space<vmem>>, %arg30: memref<1x128xf32, #tpu.memory_space<vmem>>, %arg31: memref<16x384xf32, #tpu.memory_space<vmem>>, %arg32: memref<16x128xf32, #tpu.memory_space<vmem>>) attributes {dimension_semantics = [#tpu.dimension_semantics<parallel>], iteration_bounds = array<i64: 2>, scalar_prefetch = 0 : i64, scratch_operands = 0 : i64, tpu.core_type = #tpu.core_type<tc>, window_params = [{transform_indices = @transform_0, window_bounds = array<i64: 16, 32>}, {transform_indices = @transform_1, window_bounds = array<i64: 16, 128>}, {pipeline_mode = #tpu.pipeline_mode<synchronous>, transform_indices = @transform_2, window_bounds = array<i64: 32, 128>}, {pipeline_mode = #tpu.pipeline_mode<synchronous>, transform_indices = @transform_3, window_bounds = array<i64: 1, 128>}, {pipeline_mode = #tpu.pipeline_mode<synchronous>, transform_indices = @transform_4, window_bounds = array<i64: 1, 128>}, {pipeline_mode = #tpu.pipeline_mode<synchronous>, transform_indices = @transform_5, window_bounds = array<i64: 1, 128>}, {pipeline_mode = #tpu.pipeline_mode<synchronous>, transform_indices = @transform_6, window_bounds = array<i64: 128, 64>}, {pipeline_mode = #tpu.pipeline_mode<synchronous>, transform_indices = @transform_7, window_bounds = array<i64: 1, 64>}, {pipeline_mode = #tpu.pipeline_mode<synchronous>, transform_indices = @transform_8, window_bounds = array<i64: 1, 64>}, {pipeline_mode = #tpu.pipeline_mode<synchronous>, transform_indices = @transform_9, window_bounds = array<i64: 1, 64>}, {pipeline_mode = #tpu.pipeline_mode<synchronous>, transform_indices = @transform_10, window_bounds = array<i64: 64, 32>}, {pipeline_mode = #tpu.pipeline_mode<synchronous>, transform_indices = @transform_11, window_bounds = array<i64: 1, 32>}, {pipeline_mode = #tpu.pipeline_mode<synchronous>, transform_indices = @transform_12, window_bounds = array<i64: 1, 32>}, {pipeline_mode = #tpu.pipeline_mode<synchronous>, transform_indices = @transform_13, window_bounds = array<i64: 1, 32>}, {pipeline_mode = #tpu.pipeline_mode<synchronous>, transform_indices = @transform_14, window_bounds = array<i64: 32, 256>}, {pipeline_mode = #tpu.pipeline_mode<synchronous>, transform_indices = @transform_15, window_bounds = array<i64: 1, 256>}, {pipeline_mode = #tpu.pipeline_mode<synchronous>, transform_indices = @transform_16, window_bounds = array<i64: 128, 32>}, {pipeline_mode = #tpu.pipeline_mode<synchronous>, transform_indices = @transform_17, window_bounds = array<i64: 1, 32>}, {pipeline_mode = #tpu.pipeline_mode<synchronous>, transform_indices = @transform_18, window_bounds = array<i64: 1, 32>}, {pipeline_mode = #tpu.pipeline_mode<synchronous>, transform_indices = @transform_19, window_bounds = array<i64: 1, 32>}, {pipeline_mode = #tpu.pipeline_mode<synchronous>, transform_indices = @transform_20, window_bounds = array<i64: 32, 64>}, {pipeline_mode = #tpu.pipeline_mode<synchronous>, transform_indices = @transform_21, window_bounds = array<i64: 1, 64>}, {pipeline_mode = #tpu.pipeline_mode<synchronous>, transform_indices = @transform_22, window_bounds = array<i64: 1, 64>}, {pipeline_mode = #tpu.pipeline_mode<synchronous>, transform_indices = @transform_23, window_bounds = array<i64: 1, 64>}, {pipeline_mode = #tpu.pipeline_mode<synchronous>, transform_indices = @transform_24, window_bounds = array<i64: 64, 128>}, {pipeline_mode = #tpu.pipeline_mode<synchronous>, transform_indices = @transform_25, window_bounds = array<i64: 1, 128>}, {pipeline_mode = #tpu.pipeline_mode<synchronous>, transform_indices = @transform_26, window_bounds = array<i64: 1, 128>}, {pipeline_mode = #tpu.pipeline_mode<synchronous>, transform_indices = @transform_27, window_bounds = array<i64: 1, 128>}, {pipeline_mode = #tpu.pipeline_mode<synchronous>, transform_indices = @transform_28, window_bounds = array<i64: 128, 128>}, {pipeline_mode = #tpu.pipeline_mode<synchronous>, transform_indices = @transform_29, window_bounds = array<i64: 1, 128>}, {transform_indices = @transform_30, window_bounds = array<i64: 16, 384>}, {transform_indices = @transform_31, window_bounds = array<i64: 16, 128>}]} {
    %c0 = arith.constant 0 : index
    %c0_0 = arith.constant 0 : index
    %0 = vector.load %arg1[%c0, %c0_0] : memref<16x32xf32, #tpu.memory_space<vmem>>, vector<16x32xf32>
    %1 = arith.truncf %0 : vector<16x32xf32> to vector<16x32xbf16>
    %c0_1 = arith.constant 0 : index
    %c0_2 = arith.constant 0 : index
    %2 = vector.load %arg3[%c0_1, %c0_2] : memref<32x128xbf16, #tpu.memory_space<vmem>>, vector<32x128xbf16>
    %cst = arith.constant dense<0.000000e+00> : vector<16x128xf32>
    %3 = tpu.matmul %1, %2, %cst {dimension_numbers = #tpu.dot_dimension_numbers<[1], [0], [0], [1], [0, 0, 1, 1], [], []>} : vector<16x32xbf16>, vector<32x128xbf16>, vector<16x128xf32> -> vector<16x128xf32>
    %c0_3 = arith.constant 0 : index
    %c0_4 = arith.constant 0 : index
    %4 = vector.load %arg4[%c0_3, %c0_4] : memref<1x128xf32, #tpu.memory_space<vmem>>, vector<1x128xf32>
    %5 = vector.broadcast %4 : vector<1x128xf32> to vector<16x128xf32>
    %6 = arith.addf %3, %5 : vector<16x128xf32>
    %cst_5 = arith.constant dense<0.000000e+00> : vector<16xf32>
    %7 = vector.multi_reduction <add>, %6, %cst_5 [1] : vector<16x128xf32> to vector<16xf32>
    %8 = vector.shape_cast %7 : vector<16xf32> to vector<16x1xf32>
    %cst_6 = arith.constant 1.280000e+02 : f32
    %9 = vector.broadcast %cst_6 : f32 to vector<16x1xf32>
    %10 = arith.divf %8, %9 : vector<16x1xf32>
    %11 = vector.broadcast %10 : vector<16x1xf32> to vector<16x128xf32>
    %12 = arith.subf %6, %11 : vector<16x128xf32>
    %13 = vector.broadcast %10 : vector<16x1xf32> to vector<16x128xf32>
    %14 = arith.subf %6, %13 : vector<16x128xf32>
    %15 = arith.mulf %12, %14 : vector<16x128xf32>
    %cst_7 = arith.constant dense<0.000000e+00> : vector<16xf32>
    %16 = vector.multi_reduction <add>, %15, %cst_7 [1] : vector<16x128xf32> to vector<16xf32>
    %17 = vector.shape_cast %16 : vector<16xf32> to vector<16x1xf32>
    %cst_8 = arith.constant 1.280000e+02 : f32
    %18 = vector.broadcast %cst_8 : f32 to vector<16x1xf32>
    %19 = arith.divf %17, %18 : vector<16x1xf32>
    %20 = vector.broadcast %10 : vector<16x1xf32> to vector<16x128xf32>
    %21 = arith.subf %6, %20 : vector<16x128xf32>
    %cst_9 = arith.constant 9.99999974E-6 : f32
    %22 = vector.broadcast %cst_9 : f32 to vector<16x1xf32>
    %23 = arith.addf %19, %22 : vector<16x1xf32>
    %24 = math.rsqrt %23 : vector<16x1xf32>
    %25 = vector.broadcast %24 : vector<16x1xf32> to vector<16x128xf32>
    %26 = arith.mulf %21, %25 : vector<16x128xf32>
    %c0_10 = arith.constant 0 : index
    %c0_11 = arith.constant 0 : index
    %27 = vector.load %arg5[%c0_10, %c0_11] : memref<1x128xf32, #tpu.memory_space<vmem>>, vector<1x128xf32>
    %28 = vector.broadcast %27 : vector<1x128xf32> to vector<16x128xf32>
    %29 = arith.mulf %26, %28 : vector<16x128xf32>
    %c0_12 = arith.constant 0 : index
    %c0_13 = arith.constant 0 : index
    %30 = vector.load %arg6[%c0_12, %c0_13] : memref<1x128xf32, #tpu.memory_space<vmem>>, vector<1x128xf32>
    %31 = vector.broadcast %30 : vector<1x128xf32> to vector<16x128xf32>
    %32 = arith.addf %29, %31 : vector<16x128xf32>
    %cst_14 = arith.constant 0.000000e+00 : f32
    %33 = vector.broadcast %cst_14 : f32 to vector<16x128xf32>
    %34 = arith.cmpf oge, %32, %33 : vector<16x128xf32>
    %cst_15 = arith.constant 2.000000e-02 : f32
    %35 = vector.broadcast %cst_15 : f32 to vector<16x128xf32>
    %36 = arith.mulf %35, %32 : vector<16x128xf32>
    %37 = arith.select %34, %32, %36 : vector<16x128xi1>, vector<16x128xf32>
    %38 = arith.truncf %37 : vector<16x128xf32> to vector<16x128xbf16>
    %c0_16 = arith.constant 0 : index
    %c0_17 = arith.constant 0 : index
    %39 = vector.load %arg7[%c0_16, %c0_17] : memref<128x64xbf16, #tpu.memory_space<vmem>>, vector<128x64xbf16>
    %cst_18 = arith.constant dense<0.000000e+00> : vector<16x64xf32>
    %40 = tpu.matmul %38, %39, %cst_18 {dimension_numbers = #tpu.dot_dimension_numbers<[1], [0], [0], [1], [0, 0, 1, 1], [], []>} : vector<16x128xbf16>, vector<128x64xbf16>, vector<16x64xf32> -> vector<16x64xf32>
    %c0_19 = arith.constant 0 : index
    %c0_20 = arith.constant 0 : index
    %41 = vector.load %arg8[%c0_19, %c0_20] : memref<1x64xf32, #tpu.memory_space<vmem>>, vector<1x64xf32>
    %42 = vector.broadcast %41 : vector<1x64xf32> to vector<16x64xf32>
    %43 = arith.addf %40, %42 : vector<16x64xf32>
    %cst_21 = arith.constant dense<0.000000e+00> : vector<16xf32>
    %44 = vector.multi_reduction <add>, %43, %cst_21 [1] : vector<16x64xf32> to vector<16xf32>
    %45 = vector.shape_cast %44 : vector<16xf32> to vector<16x1xf32>
    %cst_22 = arith.constant 6.400000e+01 : f32
    %46 = vector.broadcast %cst_22 : f32 to vector<16x1xf32>
    %47 = arith.divf %45, %46 : vector<16x1xf32>
    %48 = vector.broadcast %47 : vector<16x1xf32> to vector<16x64xf32>
    %49 = arith.subf %43, %48 : vector<16x64xf32>
    %50 = vector.broadcast %47 : vector<16x1xf32> to vector<16x64xf32>
    %51 = arith.subf %43, %50 : vector<16x64xf32>
    %52 = arith.mulf %49, %51 : vector<16x64xf32>
    %cst_23 = arith.constant dense<0.000000e+00> : vector<16xf32>
    %53 = vector.multi_reduction <add>, %52, %cst_23 [1] : vector<16x64xf32> to vector<16xf32>
    %54 = vector.shape_cast %53 : vector<16xf32> to vector<16x1xf32>
    %cst_24 = arith.constant 6.400000e+01 : f32
    %55 = vector.broadcast %cst_24 : f32 to vector<16x1xf32>
    %56 = arith.divf %54, %55 : vector<16x1xf32>
    %57 = vector.broadcast %47 : vector<16x1xf32> to vector<16x64xf32>
    %58 = arith.subf %43, %57 : vector<16x64xf32>
    %cst_25 = arith.constant 9.99999974E-6 : f32
    %59 = vector.broadcast %cst_25 : f32 to vector<16x1xf32>
    %60 = arith.addf %56, %59 : vector<16x1xf32>
    %61 = math.rsqrt %60 : vector<16x1xf32>
    %62 = vector.broadcast %61 : vector<16x1xf32> to vector<16x64xf32>
    %63 = arith.mulf %58, %62 : vector<16x64xf32>
    %c0_26 = arith.constant 0 : index
    %c0_27 = arith.constant 0 : index
    %64 = vector.load %arg9[%c0_26, %c0_27] : memref<1x64xf32, #tpu.memory_space<vmem>>, vector<1x64xf32>
    %65 = vector.broadcast %64 : vector<1x64xf32> to vector<16x64xf32>
    %66 = arith.mulf %63, %65 : vector<16x64xf32>
    %c0_28 = arith.constant 0 : index
    %c0_29 = arith.constant 0 : index
    %67 = vector.load %arg10[%c0_28, %c0_29] : memref<1x64xf32, #tpu.memory_space<vmem>>, vector<1x64xf32>
    %68 = vector.broadcast %67 : vector<1x64xf32> to vector<16x64xf32>
    %69 = arith.addf %66, %68 : vector<16x64xf32>
    %cst_30 = arith.constant 0.000000e+00 : f32
    %70 = vector.broadcast %cst_30 : f32 to vector<16x64xf32>
    %71 = arith.cmpf oge, %69, %70 : vector<16x64xf32>
    %cst_31 = arith.constant 2.000000e-02 : f32
    %72 = vector.broadcast %cst_31 : f32 to vector<16x64xf32>
    %73 = arith.mulf %72, %69 : vector<16x64xf32>
    %74 = arith.select %71, %69, %73 : vector<16x64xi1>, vector<16x64xf32>
    %75 = arith.truncf %74 : vector<16x64xf32> to vector<16x64xbf16>
    %c0_32 = arith.constant 0 : index
    %c0_33 = arith.constant 0 : index
    %76 = vector.load %arg11[%c0_32, %c0_33] : memref<64x32xbf16, #tpu.memory_space<vmem>>, vector<64x32xbf16>
    %cst_34 = arith.constant dense<0.000000e+00> : vector<16x32xf32>
    %77 = tpu.matmul %75, %76, %cst_34 {dimension_numbers = #tpu.dot_dimension_numbers<[1], [0], [0], [1], [0, 0, 1, 1], [], []>} : vector<16x64xbf16>, vector<64x32xbf16>, vector<16x32xf32> -> vector<16x32xf32>
    %c0_35 = arith.constant 0 : index
    %c0_36 = arith.constant 0 : index
    %78 = vector.load %arg12[%c0_35, %c0_36] : memref<1x32xf32, #tpu.memory_space<vmem>>, vector<1x32xf32>
    %79 = vector.broadcast %78 : vector<1x32xf32> to vector<16x32xf32>
    %80 = arith.addf %77, %79 : vector<16x32xf32>
    %cst_37 = arith.constant dense<0.000000e+00> : vector<16xf32>
    %81 = vector.multi_reduction <add>, %80, %cst_37 [1] : vector<16x32xf32> to vector<16xf32>
    %82 = vector.shape_cast %81 : vector<16xf32> to vector<16x1xf32>
    %cst_38 = arith.constant 3.200000e+01 : f32
    %83 = vector.broadcast %cst_38 : f32 to vector<16x1xf32>
    %84 = arith.divf %82, %83 : vector<16x1xf32>
    %85 = vector.broadcast %84 : vector<16x1xf32> to vector<16x32xf32>
    %86 = arith.subf %80, %85 : vector<16x32xf32>
    %87 = vector.broadcast %84 : vector<16x1xf32> to vector<16x32xf32>
    %88 = arith.subf %80, %87 : vector<16x32xf32>
    %89 = arith.mulf %86, %88 : vector<16x32xf32>
    %cst_39 = arith.constant dense<0.000000e+00> : vector<16xf32>
    %90 = vector.multi_reduction <add>, %89, %cst_39 [1] : vector<16x32xf32> to vector<16xf32>
    %91 = vector.shape_cast %90 : vector<16xf32> to vector<16x1xf32>
    %cst_40 = arith.constant 3.200000e+01 : f32
    %92 = vector.broadcast %cst_40 : f32 to vector<16x1xf32>
    %93 = arith.divf %91, %92 : vector<16x1xf32>
    %94 = vector.broadcast %84 : vector<16x1xf32> to vector<16x32xf32>
    %95 = arith.subf %80, %94 : vector<16x32xf32>
    %cst_41 = arith.constant 9.99999974E-6 : f32
    %96 = vector.broadcast %cst_41 : f32 to vector<16x1xf32>
    %97 = arith.addf %93, %96 : vector<16x1xf32>
    %98 = math.rsqrt %97 : vector<16x1xf32>
    %99 = vector.broadcast %98 : vector<16x1xf32> to vector<16x32xf32>
    %100 = arith.mulf %95, %99 : vector<16x32xf32>
    %c0_42 = arith.constant 0 : index
    %c0_43 = arith.constant 0 : index
    %101 = vector.load %arg13[%c0_42, %c0_43] : memref<1x32xf32, #tpu.memory_space<vmem>>, vector<1x32xf32>
    %102 = vector.broadcast %101 : vector<1x32xf32> to vector<16x32xf32>
    %103 = arith.mulf %100, %102 : vector<16x32xf32>
    %c0_44 = arith.constant 0 : index
    %c0_45 = arith.constant 0 : index
    %104 = vector.load %arg14[%c0_44, %c0_45] : memref<1x32xf32, #tpu.memory_space<vmem>>, vector<1x32xf32>
    %105 = vector.broadcast %104 : vector<1x32xf32> to vector<16x32xf32>
    %106 = arith.addf %103, %105 : vector<16x32xf32>
    %cst_46 = arith.constant 0.000000e+00 : f32
    %107 = vector.broadcast %cst_46 : f32 to vector<16x32xf32>
    %108 = arith.cmpf oge, %106, %107 : vector<16x32xf32>
    %cst_47 = arith.constant 2.000000e-02 : f32
    %109 = vector.broadcast %cst_47 : f32 to vector<16x32xf32>
    %110 = arith.mulf %109, %106 : vector<16x32xf32>
    %111 = arith.select %108, %106, %110 : vector<16x32xi1>, vector<16x32xf32>
    %112 = arith.truncf %111 : vector<16x32xf32> to vector<16x32xbf16>
    %c0_48 = arith.constant 0 : index
    %c0_49 = arith.constant 0 : index
    %113 = vector.load %arg15[%c0_48, %c0_49] : memref<32x256xbf16, #tpu.memory_space<vmem>>, vector<32x256xbf16>
    %cst_50 = arith.constant dense<0.000000e+00> : vector<16x256xf32>
    %114 = tpu.matmul %112, %113, %cst_50 {dimension_numbers = #tpu.dot_dimension_numbers<[1], [0], [0], [1], [0, 0, 1, 1], [], []>} : vector<16x32xbf16>, vector<32x256xbf16>, vector<16x256xf32> -> vector<16x256xf32>
    %c0_51 = arith.constant 0 : index
    %c0_52 = arith.constant 0 : index
    %115 = vector.load %arg16[%c0_51, %c0_52] : memref<1x256xf32, #tpu.memory_space<vmem>>, vector<1x256xf32>
    %116 = vector.broadcast %115 : vector<1x256xf32> to vector<16x256xf32>
    %117 = arith.addf %114, %116 : vector<16x256xf32>
    %118 = vector.extract_strided_slice %117 {offsets = [0, 0], sizes = [16, 128], strides = [1, 1]} : vector<16x256xf32> to vector<16x128xf32>
    %119 = vector.extract_strided_slice %117 {offsets = [0, 128], sizes = [16, 128], strides = [1, 1]} : vector<16x256xf32> to vector<16x128xf32>
    %cst_53 = arith.constant 5.000000e-01 : f32
    %120 = vector.broadcast %cst_53 : f32 to vector<16x128xf32>
    %121 = arith.mulf %120, %119 : vector<16x128xf32>
    %122 = math.exp %121 : vector<16x128xf32>
    %c0_54 = arith.constant 0 : index
    %c0_55 = arith.constant 0 : index
    %123 = vector.load %arg2[%c0_54, %c0_55] : memref<16x128xf32, #tpu.memory_space<vmem>>, vector<16x128xf32>
    %124 = arith.mulf %122, %123 : vector<16x128xf32>
    %125 = arith.addf %118, %124 : vector<16x128xf32>
    %c0_56 = arith.constant 0 : index
    %c0_57 = arith.constant 0 : index
    %126 = vector.load %arg31[%c0_56, %c0_57] : memref<16x384xf32, #tpu.memory_space<vmem>>, vector<16x128xf32>
    tpu.vector_store %arg31[%c0_56, %c0_57], %118 {strides = array<i32>} : memref<16x384xf32, #tpu.memory_space<vmem>>, vector<16x128xf32>,
    %c0_58 = arith.constant 0 : index
    %c128 = arith.constant 128 : index
    %127 = vector.load %arg31[%c0_58, %c128] : memref<16x384xf32, #tpu.memory_space<vmem>>, vector<16x128xf32>
    tpu.vector_store %arg31[%c0_58, %c128], %119 {strides = array<i32>} : memref<16x384xf32, #tpu.memory_space<vmem>>, vector<16x128xf32>,
    %c0_59 = arith.constant 0 : index
    %c256 = arith.constant 256 : index
    %128 = vector.load %arg31[%c0_59, %c256] : memref<16x384xf32, #tpu.memory_space<vmem>>, vector<16x128xf32>
    tpu.vector_store %arg31[%c0_59, %c256], %125 {strides = array<i32>} : memref<16x384xf32, #tpu.memory_space<vmem>>, vector<16x128xf32>,
    %129 = arith.truncf %125 : vector<16x128xf32> to vector<16x128xbf16>
    %c0_60 = arith.constant 0 : index
    %c0_61 = arith.constant 0 : index
    %130 = vector.load %arg17[%c0_60, %c0_61] : memref<128x32xbf16, #tpu.memory_space<vmem>>, vector<128x32xbf16>
    %cst_62 = arith.constant dense<0.000000e+00> : vector<16x32xf32>
    %131 = tpu.matmul %129, %130, %cst_62 {dimension_numbers = #tpu.dot_dimension_numbers<[1], [0], [0], [1], [0, 0, 1, 1], [], []>} : vector<16x128xbf16>, vector<128x32xbf16>, vector<16x32xf32> -> vector<16x32xf32>
    %c0_63 = arith.constant 0 : index
    %c0_64 = arith.constant 0 : index
    %132 = vector.load %arg18[%c0_63, %c0_64] : memref<1x32xf32, #tpu.memory_space<vmem>>, vector<1x32xf32>
    %133 = vector.broadcast %132 : vector<1x32xf32> to vector<16x32xf32>
    %134 = arith.addf %131, %133 : vector<16x32xf32>
    %cst_65 = arith.constant dense<0.000000e+00> : vector<16xf32>
    %135 = vector.multi_reduction <add>, %134, %cst_65 [1] : vector<16x32xf32> to vector<16xf32>
    %136 = vector.shape_cast %135 : vector<16xf32> to vector<16x1xf32>
    %cst_66 = arith.constant 3.200000e+01 : f32
    %137 = vector.broadcast %cst_66 : f32 to vector<16x1xf32>
    %138 = arith.divf %136, %137 : vector<16x1xf32>
    %139 = vector.broadcast %138 : vector<16x1xf32> to vector<16x32xf32>
    %140 = arith.subf %134, %139 : vector<16x32xf32>
    %141 = vector.broadcast %138 : vector<16x1xf32> to vector<16x32xf32>
    %142 = arith.subf %134, %141 : vector<16x32xf32>
    %143 = arith.mulf %140, %142 : vector<16x32xf32>
    %cst_67 = arith.constant dense<0.000000e+00> : vector<16xf32>
    %144 = vector.multi_reduction <add>, %143, %cst_67 [1] : vector<16x32xf32> to vector<16xf32>
    %145 = vector.shape_cast %144 : vector<16xf32> to vector<16x1xf32>
    %cst_68 = arith.constant 3.200000e+01 : f32
    %146 = vector.broadcast %cst_68 : f32 to vector<16x1xf32>
    %147 = arith.divf %145, %146 : vector<16x1xf32>
    %148 = vector.broadcast %138 : vector<16x1xf32> to vector<16x32xf32>
    %149 = arith.subf %134, %148 : vector<16x32xf32>
    %cst_69 = arith.constant 9.99999974E-6 : f32
    %150 = vector.broadcast %cst_69 : f32 to vector<16x1xf32>
    %151 = arith.addf %147, %150 : vector<16x1xf32>
    %152 = math.rsqrt %151 : vector<16x1xf32>
    %153 = vector.broadcast %152 : vector<16x1xf32> to vector<16x32xf32>
    %154 = arith.mulf %149, %153 : vector<16x32xf32>
    %c0_70 = arith.constant 0 : index
    %c0_71 = arith.constant 0 : index
    %155 = vector.load %arg19[%c0_70, %c0_71] : memref<1x32xf32, #tpu.memory_space<vmem>>, vector<1x32xf32>
    %156 = vector.broadcast %155 : vector<1x32xf32> to vector<16x32xf32>
    %157 = arith.mulf %154, %156 : vector<16x32xf32>
    %c0_72 = arith.constant 0 : index
    %c0_73 = arith.constant 0 : index
    %158 = vector.load %arg20[%c0_72, %c0_73] : memref<1x32xf32, #tpu.memory_space<vmem>>, vector<1x32xf32>
    %159 = vector.broadcast %158 : vector<1x32xf32> to vector<16x32xf32>
    %160 = arith.addf %157, %159 : vector<16x32xf32>
    %cst_74 = arith.constant 0.000000e+00 : f32
    %161 = vector.broadcast %cst_74 : f32 to vector<16x32xf32>
    %162 = arith.cmpf oge, %160, %161 : vector<16x32xf32>
    %cst_75 = arith.constant 2.000000e-02 : f32
    %163 = vector.broadcast %cst_75 : f32 to vector<16x32xf32>
    %164 = arith.mulf %163, %160 : vector<16x32xf32>
    %165 = arith.select %162, %160, %164 : vector<16x32xi1>, vector<16x32xf32>
    %166 = arith.truncf %165 : vector<16x32xf32> to vector<16x32xbf16>
    %c0_76 = arith.constant 0 : index
    %c0_77 = arith.constant 0 : index
    %167 = vector.load %arg21[%c0_76, %c0_77] : memref<32x64xbf16, #tpu.memory_space<vmem>>, vector<32x64xbf16>
    %cst_78 = arith.constant dense<0.000000e+00> : vector<16x64xf32>
    %168 = tpu.matmul %166, %167, %cst_78 {dimension_numbers = #tpu.dot_dimension_numbers<[1], [0], [0], [1], [0, 0, 1, 1], [], []>} : vector<16x32xbf16>, vector<32x64xbf16>, vector<16x64xf32> -> vector<16x64xf32>
    %c0_79 = arith.constant 0 : index
    %c0_80 = arith.constant 0 : index
    %169 = vector.load %arg22[%c0_79, %c0_80] : memref<1x64xf32, #tpu.memory_space<vmem>>, vector<1x64xf32>
    %170 = vector.broadcast %169 : vector<1x64xf32> to vector<16x64xf32>
    %171 = arith.addf %168, %170 : vector<16x64xf32>
    %cst_81 = arith.constant dense<0.000000e+00> : vector<16xf32>
    %172 = vector.multi_reduction <add>, %171, %cst_81 [1] : vector<16x64xf32> to vector<16xf32>
    %173 = vector.shape_cast %172 : vector<16xf32> to vector<16x1xf32>
    %cst_82 = arith.constant 6.400000e+01 : f32
    %174 = vector.broadcast %cst_82 : f32 to vector<16x1xf32>
    %175 = arith.divf %173, %174 : vector<16x1xf32>
    %176 = vector.broadcast %175 : vector<16x1xf32> to vector<16x64xf32>
    %177 = arith.subf %171, %176 : vector<16x64xf32>
    %178 = vector.broadcast %175 : vector<16x1xf32> to vector<16x64xf32>
    %179 = arith.subf %171, %178 : vector<16x64xf32>
    %180 = arith.mulf %177, %179 : vector<16x64xf32>
    %cst_83 = arith.constant dense<0.000000e+00> : vector<16xf32>
    %181 = vector.multi_reduction <add>, %180, %cst_83 [1] : vector<16x64xf32> to vector<16xf32>
    %182 = vector.shape_cast %181 : vector<16xf32> to vector<16x1xf32>
    %cst_84 = arith.constant 6.400000e+01 : f32
    %183 = vector.broadcast %cst_84 : f32 to vector<16x1xf32>
    %184 = arith.divf %182, %183 : vector<16x1xf32>
    %185 = vector.broadcast %175 : vector<16x1xf32> to vector<16x64xf32>
    %186 = arith.subf %171, %185 : vector<16x64xf32>
    %cst_85 = arith.constant 9.99999974E-6 : f32
    %187 = vector.broadcast %cst_85 : f32 to vector<16x1xf32>
    %188 = arith.addf %184, %187 : vector<16x1xf32>
    %189 = math.rsqrt %188 : vector<16x1xf32>
    %190 = vector.broadcast %189 : vector<16x1xf32> to vector<16x64xf32>
    %191 = arith.mulf %186, %190 : vector<16x64xf32>
    %c0_86 = arith.constant 0 : index
    %c0_87 = arith.constant 0 : index
    %192 = vector.load %arg23[%c0_86, %c0_87] : memref<1x64xf32, #tpu.memory_space<vmem>>, vector<1x64xf32>
    %193 = vector.broadcast %192 : vector<1x64xf32> to vector<16x64xf32>
    %194 = arith.mulf %191, %193 : vector<16x64xf32>
    %c0_88 = arith.constant 0 : index
    %c0_89 = arith.constant 0 : index
    %195 = vector.load %arg24[%c0_88, %c0_89] : memref<1x64xf32, #tpu.memory_space<vmem>>, vector<1x64xf32>
    %196 = vector.broadcast %195 : vector<1x64xf32> to vector<16x64xf32>
    %197 = arith.addf %194, %196 : vector<16x64xf32>
    %cst_90 = arith.constant 0.000000e+00 : f32
    %198 = vector.broadcast %cst_90 : f32 to vector<16x64xf32>
    %199 = arith.cmpf oge, %197, %198 : vector<16x64xf32>
    %cst_91 = arith.constant 2.000000e-02 : f32
    %200 = vector.broadcast %cst_91 : f32 to vector<16x64xf32>
    %201 = arith.mulf %200, %197 : vector<16x64xf32>
    %202 = arith.select %199, %197, %201 : vector<16x64xi1>, vector<16x64xf32>
    %203 = arith.truncf %202 : vector<16x64xf32> to vector<16x64xbf16>
    %c0_92 = arith.constant 0 : index
    %c0_93 = arith.constant 0 : index
    %204 = vector.load %arg25[%c0_92, %c0_93] : memref<64x128xbf16, #tpu.memory_space<vmem>>, vector<64x128xbf16>
    %cst_94 = arith.constant dense<0.000000e+00> : vector<16x128xf32>
    %205 = tpu.matmul %203, %204, %cst_94 {dimension_numbers = #tpu.dot_dimension_numbers<[1], [0], [0], [1], [0, 0, 1, 1], [], []>} : vector<16x64xbf16>, vector<64x128xbf16>, vector<16x128xf32> -> vector<16x128xf32>
    %c0_95 = arith.constant 0 : index
    %c0_96 = arith.constant 0 : index
    %206 = vector.load %arg26[%c0_95, %c0_96] : memref<1x128xf32, #tpu.memory_space<vmem>>, vector<1x128xf32>
    %207 = vector.broadcast %206 : vector<1x128xf32> to vector<16x128xf32>
    %208 = arith.addf %205, %207 : vector<16x128xf32>
    %cst_97 = arith.constant dense<0.000000e+00> : vector<16xf32>
    %209 = vector.multi_reduction <add>, %208, %cst_97 [1] : vector<16x128xf32> to vector<16xf32>
    %210 = vector.shape_cast %209 : vector<16xf32> to vector<16x1xf32>
    %cst_98 = arith.constant 1.280000e+02 : f32
    %211 = vector.broadcast %cst_98 : f32 to vector<16x1xf32>
    %212 = arith.divf %210, %211 : vector<16x1xf32>
    %213 = vector.broadcast %212 : vector<16x1xf32> to vector<16x128xf32>
    %214 = arith.subf %208, %213 : vector<16x128xf32>
    %215 = vector.broadcast %212 : vector<16x1xf32> to vector<16x128xf32>
    %216 = arith.subf %208, %215 : vector<16x128xf32>
    %217 = arith.mulf %214, %216 : vector<16x128xf32>
    %cst_99 = arith.constant dense<0.000000e+00> : vector<16xf32>
    %218 = vector.multi_reduction <add>, %217, %cst_99 [1] : vector<16x128xf32> to vector<16xf32>
    %219 = vector.shape_cast %218 : vector<16xf32> to vector<16x1xf32>
    %cst_100 = arith.constant 1.280000e+02 : f32
    %220 = vector.broadcast %cst_100 : f32 to vector<16x1xf32>
    %221 = arith.divf %219, %220 : vector<16x1xf32>
    %222 = vector.broadcast %212 : vector<16x1xf32> to vector<16x128xf32>
    %223 = arith.subf %208, %222 : vector<16x128xf32>
    %cst_101 = arith.constant 9.99999974E-6 : f32
    %224 = vector.broadcast %cst_101 : f32 to vector<16x1xf32>
    %225 = arith.addf %221, %224 : vector<16x1xf32>
    %226 = math.rsqrt %225 : vector<16x1xf32>
    %227 = vector.broadcast %226 : vector<16x1xf32> to vector<16x128xf32>
    %228 = arith.mulf %223, %227 : vector<16x128xf32>
    %c0_102 = arith.constant 0 : index
    %c0_103 = arith.constant 0 : index
    %229 = vector.load %arg27[%c0_102, %c0_103] : memref<1x128xf32, #tpu.memory_space<vmem>>, vector<1x128xf32>
    %230 = vector.broadcast %229 : vector<1x128xf32> to vector<16x128xf32>
    %231 = arith.mulf %228, %230 : vector<16x128xf32>
    %c0_104 = arith.constant 0 : index
    %c0_105 = arith.constant 0 : index
    %232 = vector.load %arg28[%c0_104, %c0_105] : memref<1x128xf32, #tpu.memory_space<vmem>>, vector<1x128xf32>
    %233 = vector.broadcast %232 : vector<1x128xf32> to vector<16x128xf32>
    %234 = arith.addf %231, %233 : vector<16x128xf32>
    %cst_106 = arith.constant 0.000000e+00 : f32
    %235 = vector.broadcast %cst_106 : f32 to vector<16x128xf32>
    %236 = arith.cmpf oge, %234, %235 : vector<16x128xf32>
    %cst_107 = arith.constant 2.000000e-02 : f32
    %237 = vector.broadcast %cst_107 : f32 to vector<16x128xf32>
    %238 = arith.mulf %237, %234 : vector<16x128xf32>
    %239 = arith.select %236, %234, %238 : vector<16x128xi1>, vector<16x128xf32>
    %240 = arith.truncf %239 : vector<16x128xf32> to vector<16x128xbf16>
    %c0_108 = arith.constant 0 : index
    %c0_109 = arith.constant 0 : index
    %241 = vector.load %arg29[%c0_108, %c0_109] : memref<128x128xbf16, #tpu.memory_space<vmem>>, vector<128x128xbf16>
    %cst_110 = arith.constant dense<0.000000e+00> : vector<16x128xf32>
    %242 = tpu.matmul %240, %241, %cst_110 {dimension_numbers = #tpu.dot_dimension_numbers<[1], [0], [0], [1], [0, 0, 1, 1], [], []>} : vector<16x128xbf16>, vector<128x128xbf16>, vector<16x128xf32> -> vector<16x128xf32>
    %c0_111 = arith.constant 0 : index
    %c0_112 = arith.constant 0 : index
    %243 = vector.load %arg30[%c0_111, %c0_112] : memref<1x128xf32, #tpu.memory_space<vmem>>, vector<1x128xf32>
    %244 = vector.broadcast %243 : vector<1x128xf32> to vector<16x128xf32>
    %245 = arith.addf %242, %244 : vector<16x128xf32>
    %cst_113 = arith.constant dense<0xFF800000> : vector<16xf32>
    %246 = vector.multi_reduction <maximumf>, %245, %cst_113 [1] : vector<16x128xf32> to vector<16xf32>
    %247 = vector.shape_cast %246 : vector<16xf32> to vector<16x1xf32>
    %248 = vector.broadcast %247 : vector<16x1xf32> to vector<16x128xf32>
    %249 = arith.subf %245, %248 : vector<16x128xf32>
    %250 = math.exp %249 : vector<16x128xf32>
    %cst_114 = arith.constant dense<0.000000e+00> : vector<16xf32>
    %251 = vector.multi_reduction <add>, %250, %cst_114 [1] : vector<16x128xf32> to vector<16xf32>
    %252 = vector.shape_cast %251 : vector<16xf32> to vector<16x1xf32>
    %253 = vector.broadcast %252 : vector<16x1xf32> to vector<16x128xf32>
    %254 = arith.divf %250, %253 : vector<16x128xf32>
    %c0_115 = arith.constant 0 : index
    %c0_116 = arith.constant 0 : index
    %255 = vector.load %arg32[%c0_115, %c0_116] : memref<16x128xf32, #tpu.memory_space<vmem>>, vector<16x128xf32>
    tpu.vector_store %arg32[%c0_115, %c0_116], %254 {strides = array<i32>} : memref<16x128xf32, #tpu.memory_space<vmem>>, vector<16x128xf32>,
    return
  }
  func.func @transform_0(%arg0: i32) -> (i32, i32) {
    %c0_i32 = arith.constant 0 : i32
    %c0_i32_0 = arith.constant 0 : i32
    return %arg0, %c0_i32 : i32, i32
  }
  func.func @transform_1(%arg0: i32) -> (i32, i32) {
    %c0_i32 = arith.constant 0 : i32
    %c0_i32_0 = arith.constant 0 : i32
    return %arg0, %c0_i32 : i32, i32
  }
  func.func @transform_2(%arg0: i32) -> (i32, i32) {
    %c0_i32 = arith.constant 0 : i32
    %c0_i32_0 = arith.constant 0 : i32
    %c0_i32_1 = arith.constant 0 : i32
    return %c0_i32, %c0_i32_0 : i32, i32
  }
  func.func @transform_3(%arg0: i32) -> (i32, i32) {
    %c0_i32 = arith.constant 0 : i32
    %c0_i32_0 = arith.constant 0 : i32
    %c0_i32_1 = arith.constant 0 : i32
    return %c0_i32, %c0_i32_0 : i32, i32
  }
  func.func @transform_4(%arg0: i32) -> (i32, i32) {
    %c0_i32 = arith.constant 0 : i32
    %c0_i32_0 = arith.constant 0 : i32
    %c0_i32_1 = arith.constant 0 : i32
    return %c0_i32, %c0_i32_0 : i32, i32
  }
  func.func @transform_5(%arg0: i32) -> (i32, i32) {
    %c0_i32 = arith.constant 0 : i32
    %c0_i32_0 = arith.constant 0 : i32
    %c0_i32_1 = arith.constant 0 : i32
    return %c0_i32, %c0_i32_0 : i32, i32
  }
  func.func @transform_6(%arg0: i32) -> (i32, i32) {
    %c0_i32 = arith.constant 0 : i32
    %c0_i32_0 = arith.constant 0 : i32
    %c0_i32_1 = arith.constant 0 : i32
    return %c0_i32, %c0_i32_0 : i32, i32
  }
  func.func @transform_7(%arg0: i32) -> (i32, i32) {
    %c0_i32 = arith.constant 0 : i32
    %c0_i32_0 = arith.constant 0 : i32
    %c0_i32_1 = arith.constant 0 : i32
    return %c0_i32, %c0_i32_0 : i32, i32
  }
  func.func @transform_8(%arg0: i32) -> (i32, i32) {
    %c0_i32 = arith.constant 0 : i32
    %c0_i32_0 = arith.constant 0 : i32
    %c0_i32_1 = arith.constant 0 : i32
    return %c0_i32, %c0_i32_0 : i32, i32
  }
  func.func @transform_9(%arg0: i32) -> (i32, i32) {
    %c0_i32 = arith.constant 0 : i32
    %c0_i32_0 = arith.constant 0 : i32
    %c0_i32_1 = arith.constant 0 : i32
    return %c0_i32, %c0_i32_0 : i32, i32
  }
  func.func @transform_10(%arg0: i32) -> (i32, i32) {
    %c0_i32 = arith.constant 0 : i32
    %c0_i32_0 = arith.constant 0 : i32
    %c0_i32_1 = arith.constant 0 : i32
    return %c0_i32, %c0_i32_0 : i32, i32
  }
  func.func @transform_11(%arg0: i32) -> (i32, i32) {
    %c0_i32 = arith.constant 0 : i32
    %c0_i32_0 = arith.constant 0 : i32
    %c0_i32_1 = arith.constant 0 : i32
    return %c0_i32, %c0_i32_0 : i32, i32
  }
  func.func @transform_12(%arg0: i32) -> (i32, i32) {
    %c0_i32 = arith.constant 0 : i32
    %c0_i32_0 = arith.constant 0 : i32
    %c0_i32_1 = arith.constant 0 : i32
    return %c0_i32, %c0_i32_0 : i32, i32
  }
  func.func @transform_13(%arg0: i32) -> (i32, i32) {
    %c0_i32 = arith.constant 0 : i32
    %c0_i32_0 = arith.constant 0 : i32
    %c0_i32_1 = arith.constant 0 : i32
    return %c0_i32, %c0_i32_0 : i32, i32
  }
  func.func @transform_14(%arg0: i32) -> (i32, i32) {
    %c0_i32 = arith.constant 0 : i32
    %c0_i32_0 = arith.constant 0 : i32
    %c0_i32_1 = arith.constant 0 : i32
    return %c0_i32, %c0_i32_0 : i32, i32
  }
  func.func @transform_15(%arg0: i32) -> (i32, i32) {
    %c0_i32 = arith.constant 0 : i32
    %c0_i32_0 = arith.constant 0 : i32
    %c0_i32_1 = arith.constant 0 : i32
    return %c0_i32, %c0_i32_0 : i32, i32
  }
  func.func @transform_16(%arg0: i32) -> (i32, i32) {
    %c0_i32 = arith.constant 0 : i32
    %c0_i32_0 = arith.constant 0 : i32
    %c0_i32_1 = arith.constant 0 : i32
    return %c0_i32, %c0_i32_0 : i32, i32
  }
  func.func @transform_17(%arg0: i32) -> (i32, i32) {
    %c0_i32 = arith.constant 0 : i32
    %c0_i32_0 = arith.constant 0 : i32
    %c0_i32_1 = arith.constant 0 : i32
    return %c0_i32, %c0_i32_0 : i32, i32
  }
  func.func @transform_18(%arg0: i32) -> (i32, i32) {
    %c0_i32 = arith.constant 0 : i32
    %c0_i32_0 = arith.constant 0 : i32
    %c0_i32_1 = arith.constant 0 : i32
    return %c0_i32, %c0_i32_0 : i32, i32
  }
  func.func @transform_19(%arg0: i32) -> (i32, i32) {
    %c0_i32 = arith.constant 0 : i32
    %c0_i32_0 = arith.constant 0 : i32
    %c0_i32_1 = arith.constant 0 : i32
    return %c0_i32, %c0_i32_0 : i32, i32
  }
  func.func @transform_20(%arg0: i32) -> (i32, i32) {
    %c0_i32 = arith.constant 0 : i32
    %c0_i32_0 = arith.constant 0 : i32
    %c0_i32_1 = arith.constant 0 : i32
    return %c0_i32, %c0_i32_0 : i32, i32
  }
  func.func @transform_21(%arg0: i32) -> (i32, i32) {
    %c0_i32 = arith.constant 0 : i32
    %c0_i32_0 = arith.constant 0 : i32
    %c0_i32_1 = arith.constant 0 : i32
    return %c0_i32, %c0_i32_0 : i32, i32
  }
  func.func @transform_22(%arg0: i32) -> (i32, i32) {
    %c0_i32 = arith.constant 0 : i32
    %c0_i32_0 = arith.constant 0 : i32
    %c0_i32_1 = arith.constant 0 : i32
    return %c0_i32, %c0_i32_0 : i32, i32
  }
  func.func @transform_23(%arg0: i32) -> (i32, i32) {
    %c0_i32 = arith.constant 0 : i32
    %c0_i32_0 = arith.constant 0 : i32
    %c0_i32_1 = arith.constant 0 : i32
    return %c0_i32, %c0_i32_0 : i32, i32
  }
  func.func @transform_24(%arg0: i32) -> (i32, i32) {
    %c0_i32 = arith.constant 0 : i32
    %c0_i32_0 = arith.constant 0 : i32
    %c0_i32_1 = arith.constant 0 : i32
    return %c0_i32, %c0_i32_0 : i32, i32
  }
  func.func @transform_25(%arg0: i32) -> (i32, i32) {
    %c0_i32 = arith.constant 0 : i32
    %c0_i32_0 = arith.constant 0 : i32
    %c0_i32_1 = arith.constant 0 : i32
    return %c0_i32, %c0_i32_0 : i32, i32
  }
  func.func @transform_26(%arg0: i32) -> (i32, i32) {
    %c0_i32 = arith.constant 0 : i32
    %c0_i32_0 = arith.constant 0 : i32
    %c0_i32_1 = arith.constant 0 : i32
    return %c0_i32, %c0_i32_0 : i32, i32
  }
  func.func @transform_27(%arg0: i32) -> (i32, i32) {
    %c0_i32 = arith.constant 0 : i32
    %c0_i32_0 = arith.constant 0 : i32
    %c0_i32_1 = arith.constant 0 : i32
    return %c0_i32, %c0_i32_0 : i32, i32
  }
  func.func @transform_28(%arg0: i32) -> (i32, i32) {
    %c0_i32 = arith.constant 0 : i32
    %c0_i32_0 = arith.constant 0 : i32
    %c0_i32_1 = arith.constant 0 : i32
    return %c0_i32, %c0_i32_0 : i32, i32
  }
  func.func @transform_29(%arg0: i32) -> (i32, i32) {
    %c0_i32 = arith.constant 0 : i32
    %c0_i32_0 = arith.constant 0 : i32
    %c0_i32_1 = arith.constant 0 : i32
    return %c0_i32, %c0_i32_0 : i32, i32
  }
  func.func @transform_30(%arg0: i32) -> (i32, i32) {
    %c0_i32 = arith.constant 0 : i32
    %c0_i32_0 = arith.constant 0 : i32
    return %arg0, %c0_i32 : i32, i32
  }
  func.func @transform_31(%arg0: i32) -> (i32, i32) {
    %c0_i32 = arith.constant 0 : i32
    %c0_i32_0 = arith.constant 0 : i32
    return %arg0, %c0_i32 : i32, i32
  }
}

</mosaic_0001>

<bundles_post_ra>
// kernel: vae_forward.1
= control target key start
LH: loop header
LB: loop body
LE: loop exit
PB: predicated region body
PF: predicated region fallthrough
CT: control target
= control target key end

     0   :  { %s2659_s6 = smov 1   ;;  %s2660_s10 = smov 2   ;;  %s3096_s0 = inlined_call_operand.smem [shape: u32[32], index: -1, kind: input, shape index: {}] }
   0x1   :  { %s2704_s5 = sld [smem:[%s3096_s0]]   ;;  %s2661_s14 = smov 3  }
   0x2   :  { %s2709_s9 = sld [smem:[%s3096_s0 + %s2659_s6]]   ;;  %s2662_s18 = smov 4  }
   0x3   :  { %s2714_s13 = sld [smem:[%s3096_s0 + %s2660_s10]]   ;;  %s2663_s22 = smov 5  }
   0x4   :  { %s2719_s17 = sld [smem:[%s3096_s0 + %s2661_s14]]   ;;  %s2664_s26 = smov 6  }
   0x5   :  { %s2724_s21 = sld [smem:[%s3096_s0 + %s2662_s18]]   ;;  %s2665_s30 = smov 7  }
   0x6   :  { %s2729_s25 = sld [smem:[%s3096_s0 + %s2663_s22]]   ;;  %s2666_s4 = smov 8  }
   0x7   :  { %3103 = sst [smem:[#allocation5_spill]] %s2704_s5  ;;  %s2667_s10 = smov 9  }
   0x8   :  { %3104 = sst [smem:[#allocation6_spill]] %s2709_s9  ;;  %s2668_s15 = smov 10  }
   0x9   :  { %s2734_s29 = sld [smem:[%s3096_s0 + %s2664_s26]]   ;;  %s2669_s20 = smov 11  }
   0xa   :  { %s2739_s3 = sld [smem:[%s3096_s0 + %s2665_s30]]   ;;  %s2670_s26 = smov 12  }
   0xb   :  { %s2744_s8 = sld [smem:[%s3096_s0 + %s2666_s4]]   ;;  %s2671_s1 = smov 13  }
   0xc   :  { %s2749_s14 = sld [smem:[%s3096_s0 + %s2667_s10]]   ;;  %s2672_s7 = smov 14  }
   0xd   :  { %s2754_s19 = sld [smem:[%s3096_s0 + %s2668_s15]]   ;;  %s2673_s15 = smov 15  }
   0xe   :  { %s2759_s24 = sld [smem:[%s3096_s0 + %s2669_s20]]   ;;  %s2674_s22 = smov 16  }
   0xf   :  { %s2764_s30 = sld [smem:[%s3096_s0 + %s2670_s26]]   ;;  %s2675_s28 = smov 17  }
  0x10   :  { %3105 = sst [smem:[#allocation7_spill]] %s2739_s3 }
  0x11   :  { %3106 = sst [smem:[#allocation8_spill]] %s2744_s8 }
  0x12   :  { %s2769_s6 = sld [smem:[%s3096_s0 + %s2671_s1]]  }
  0x13   :  { %s2774_s12 = sld [smem:[%s3096_s0 + %s2672_s7]]   ;;  %s2676_s7 = smov 18  }
  0x14   :  { %s2779_s20 = sld [smem:[%s3096_s0 + %s2673_s15]]   ;;  %s2677_s15 = smov 19  }
  0x15   :  { %s2784_s27 = sld [smem:[%s3096_s0 + %s2674_s22]]   ;;  %s2678_s22 = smov 20  }
  0x16   :  { %s2789_s4 = sld [smem:[%s3096_s0 + %s2675_s28]]   ;;  %s2679_s28 = smov 21  }
  0x17   :  { %s2794_s9 = sld [smem:[%s3096_s0 + %s2676_s7]]   ;;  %s2680_s7 = smov 22  }
  0x18   :  { %3107 = sst [smem:[#allocation9_spill]] %s2769_s6 }
  0x1a   :  { %3108 = sst [smem:[#allocation10_spill]] %s2779_s20 }
  0x1b   :  { %3109 = sst [smem:[#allocation11_spill]] %s2784_s27 }
  0x1c   :  { %3110 = sst [smem:[#allocation12_spill]] %s2789_s4 }
  0x1d   :  { %3111 = sst [smem:[#allocation13_spill]] %s2794_s9 }
  0x1e   :  { %s2799_s20 = sld [smem:[%s3096_s0 + %s2677_s15]]   ;;  %s2681_s15 = smov 23  }
  0x1f   :  { %s2804_s27 = sld [smem:[%s3096_s0 + %s2678_s22]]   ;;  %s2682_s22 = smov 24  }
  0x20   :  { %s2809_s4 = sld [smem:[%s3096_s0 + %s2679_s28]]   ;;  %s2683_s28 = smov 25  }
  0x21   :  { %s2814_s9 = sld [smem:[%s3096_s0 + %s2680_s7]]   ;;  %s2684_s7 = smov 26  }
  0x24   :  { %3112 = sst [smem:[#allocation14_spill]] %s2799_s20 }
  0x25   :  { %3113 = sst [smem:[#allocation15_spill]] %s2804_s27 }
  0x26   :  { %3114 = sst [smem:[#allocation16_spill]] %s2809_s4 }
  0x27   :  { %3115 = sst [smem:[#allocation17_spill]] %s2814_s9 }
  0x28   :  { %s2819_s20 = sld [smem:[%s3096_s0 + %s2681_s15]]   ;;  %s2685_s15 = smov 27  }
  0x29   :  { %s2824_s27 = sld [smem:[%s3096_s0 + %s2682_s22]]   ;;  %s2686_s22 = smov 28  }
  0x2a   :  { %s2829_s4 = sld [smem:[%s3096_s0 + %s2683_s28]]   ;;  %s2687_s28 = smov 29  }
  0x2b   :  { %s2834_s9 = sld [smem:[%s3096_s0 + %s2684_s7]]   ;;  %s2688_s7 = smov 30  }
  0x2e   :  { %3116 = sst [smem:[#allocation18_spill]] %s2819_s20 }
  0x2f   :  { %3117 = sst [smem:[#allocation19_spill]] %s2824_s27 }
  0x30   :  { %3118 = sst [smem:[#allocation20_spill]] %s2829_s4 }
  0x31   :  { %3119 = sst [smem:[#allocation21_spill]] %s2834_s9 }
  0x32   :  { %s2839_s20 = sld [smem:[%s3096_s0 + %s2685_s15]]   ;;  %s2689_s15 = smov 31  }
  0x33   :  { %s2844_s27 = sld [smem:[%s3096_s0 + %s2686_s22]]  }
  0x34   :  { %s2849_s4 = sld [smem:[%s3096_s0 + %s2687_s28]]  }
  0x35   :  { %s2854_s9 = sld [smem:[%s3096_s0 + %s2688_s7]]  }
  0x38   :  { %3120 = sst [smem:[#allocation22_spill]] %s2839_s20 }
  0x39   :  { %s2859_s20 = sld [smem:[%s3096_s0 + %s2689_s15]]  }
  0x3a   :  { %3121 = sst [smem:[#allocation23_spill]] %s2849_s4 }
  0x3b   :  { %69 = vsyncpa [#allocation3], 0 }
  0x3c   :  { %71 = vsyncpa [#allocation3 + $0x1], 0  ;;  %s2861_s22 = smov 0   ;;  %s2863_s23 = smov 0  }
  0x3d   :  { %s2865_s26 = smov 0   ;;  %s2867_s28 = smov 0  }
  0x3e LB: > { %s2882_s0 = sadd.s32 4294967295, %s2657_s28   ;;  %s2217_s1 = sadd.s32 4294967294, %s2657_s28   ;;  %s2657_s28 = sphi %s2867_s28, %s3147_s28   ;;  %s2653_s26 = sphi %s2865_s26, %s3146_s26   ;;  %s2649_s23 = sphi %s2863_s23, %s3145_s23   ;;  %s2645_s22 = sphi %s2861_s22, %s3144_s22  }
  0x3f   : > { %s2886_s2 = sadd.s32 1, %s2657_s28   ;;  %s750_s7 = sadd.s32 1, %s2653_s26 }
  0x40   : > { %s747_s10 = ssub.s32 %s2657_s28, %s2886_s2  ;;  %p760_p0 = scmp.ne.s32.totalorder %s2653_s26, %s2649_s23 }
  0x41   : > { %p748_p1 = scmp.eq.s32.totalorder %s747_s10, 0  ;;  %p761_p2 = scmp.eq.s32.totalorder %s2882_s0, 1 }
  0x42   : > { %p766_p3 = scmp.ne.s32.totalorder %s2649_s23, %s2645_s22  ;;  %p767_p4 = scmp.eq.s32.totalorder %s2217_s1, 1 }
  0x43   : > { %s2897_s11 = scalar_select %p748_p1, %s2653_s26, %s750_s7  }
  0x44   : > { %p2899_p5 = por %p761_p2, %p760_p0  ;;  %p2903_p6 = por %p767_p4, %p766_p3 }
  0x45   : > { %p2220_p7 = scmp.ge.s32.totalorder %s2657_s28, 1  ;;  %p887_p8 = scmp.lt.s32.totalorder %s2657_s28, 3 }
  0x47   : > { %p888_p9 = pnand %p2220_p7, %p887_p8 }
  0x48   : > { %v2517_v0 = vld [vmem:[%s2714_s13] sm:$0xff] (!%p888_p9)   ;;  %s3124_s5 = sld [smem:[#allocation5_spill]] (!%p888_p9)  ;;  %v2690_v1 = vmov (!%p888_p9), 0.0   ;;  %v2518_v2 = vld [vmem:[%s2714_s13 + $0x8] sm:$0xff] (!%p888_p9)   ;;  %vm2691_vm0 = vmmov (!%p888_p9), 0   ;;  %s2222_s18 = sshll.u32 (!%p888_p9), %s2882_s0, 1 }
  0x49   : > { %891 = sbr.rel (%p888_p9) target bundleno = 4069 (0xfe5), region = 140  ;;  %2341 = vmatprep.subr.bf16.mxu0 (!%p888_p9), %v2690_v1  ;;  %2349 = vmatprep.subr.bf16.mxu1 (!%p888_p9), %v2690_v1  ;;  %p979_p10 = scmp.lt.s32.totalorder (!%p888_p9), %s2222_s18, 3  ;;  %vm1025_vm1 = vcmask (!%p888_p9), 261120   ;;  %v2228_v6 = vld [vmem:[%s2719_s17] ss:$0 sm:$0xff] (!%p888_p9)  ;;  %v2520_v22 = vld [vmem:[%s2734_s29 + $0x8] sm:$0xff] (!%p888_p9)  }
  0x4a   : > { %2342 = vmatpush3.bf16.msra.mxu0 (!%p888_p9), %v2517_v0  ;;  %2345 = vmatprep.mubr.msk.bf16.mxu0 (!%p888_p9), %vm2691_vm0, %v2690_v1  ;;  %v2519_v13 = vld [vmem:[%s2734_s29] sm:$0xff] (!%p888_p9)   ;;  %v2521_v23 = vld [vmem:[%s2734_s29 + $0x10] sm:$0xff] (!%p888_p9)   ;;  %v2522_v24 = vld [vmem:[%s2734_s29 + $0x18] sm:$0xff] (!%p888_p9)   ;;  %s3125_s3 = sld [smem:[#allocation7_spill]] (!%p888_p9)  ;;  %vm1230_vm4 = vcmask (!%p888_p9), 523264   ;;  %s3126_s8 = sld [smem:[#allocation8_spill]] (!%p888_p9) }
  0x4b   : > { %2343 = vmatprep.subr.bf16.mxu0 (!%p888_p9), %v2690_v1  ;;  %2365 = vmatprep.mubr.msk.bf16.mxu1 (!%p888_p9), %vm2691_vm0, %v2690_v1  ;;  %v2523_v25 = vld [vmem:[%s2734_s29 + $0x20] sm:$0xff] (!%p888_p9)   ;;  %v2524_v26 = vld [vmem:[%s2734_s29 + $0x28] sm:$0xff] (!%p888_p9)   ;;  %v2525_v27 = vld [vmem:[%s2734_s29 + $0x30] sm:$0xff] (!%p888_p9)   ;;  %s3127_s6 = sld [smem:[#allocation9_spill]] (!%p888_p9)  ;;  %s3128_s10 = sld [smem:[#allocation11_spill]] (!%p888_p9) }
  0x4c   : > { %2350 = vmatpush3.bf16.msra.mxu1 (!%p888_p9), %v2519_v13  ;;  %v2526_v28 = vld [vmem:[%s2734_s29 + $0x38] sm:$0xff] (!%p888_p9)   ;;  %v2232_v36 = vld [vmem:[%s2724_s21] ss:$0 sm:$0xff] (!%p888_p9)  ;;  %s3143_s4 = sld [smem:[#allocation23_spill]] (!%p888_p9) }
  0x4d   : > { %2351 = vmatprep.subr.bf16.mxu1 (!%p888_p9), %v2690_v1  ;;  %v2233_v38 = vld [vmem:[%s2729_s25] ss:$0 sm:$0xff] (!%p888_p9) }
  0x4e   : > { %2344 = vmatpush3.bf16.msra.mxu0 (!%p888_p9), %v2518_v2 }
  0x4f   : > { %2369 = vmatprep.subr.bf16.mxu0 (!%p888_p9), %v2690_v1 }
  0x50   : > { %s3149_s18 = smov (!%p979_p10, %s2222_s18), 3  ;;  %2352 = vmatpush3.bf16.msra.mxu1 %v2520_v22  ;;  %v2234_v50 = vld [vmem:[%s3125_s3] ss:$0 sm:$0xff] }
  0x51   : > { %s3100_s1 = sshll.u32 %s3149_s18, 3  ;;  %2353 = vmatprep.subr.bf16.mxu1 %v2690_v1 }
  0x52   : > { %s982_s7 = scalar_lea.vmem %s3124_s5, %s3100_s1  ;;  %s2441_s1 = smul.u32 24, %s3149_s18 }
  0x53   : > { %v999_v3 = vld [vmem:[%s982_s7] sm:$0xff]  ;;  %v1000_v4 = vld [vmem:[%s982_s7 + $0x8] sm:$0xff]  ;;  %s3129_s7 = sld [smem:[#allocation10_spill]]  ;;  %s3130_s5 = sld [smem:[#allocation6_spill]] }
  0x54   : > { %v1001_v5 = vpack.c.bf16 %v1000_v4, %v999_v3  ;;  %2354 = vmatpush3.bf16.msra.mxu1 %v2521_v23  ;;  %s995_s3 = scalar_lea.vmem %s2854_s9, %s2441_s1  ;;  %s3131_s1 = sld [smem:[#allocation12_spill]] }
  0x55   : > { %2355 = vmatprep.subr.bf16.mxu1 %v2690_v1 }
  0x56   : > { %2346 = vmatmul.mubr.msk.bf16.vlgmr.msra.gmra.mrb[0].mxu0 %vm1025_vm1, %v1001_v5 }
  0x57   : > { %2377 = vmatprep.mubr.msk.bf16.mxu0 %vm2691_vm0, %v2690_v1 }
  0x58   : > { %2356 = vmatpush3.bf16.msra.mxu1 %v2522_v24 }
  0x59   : > { %2357 = vmatprep.subr.bf16.mxu1 %v2690_v1 }
  0x5c   : > { %2358 = vmatpush3.bf16.msra.mxu1 %v2523_v25 }
  0x5d   : > { %2359 = vmatprep.subr.bf16.mxu1 %v2690_v1 }
  0x60   : > { %2360 = vmatpush3.bf16.msra.mxu1 %v2524_v26 }
  0x61   : > { %2361 = vmatprep.subr.bf16.mxu1 %v2690_v1 }
  0x64   : > { %2362 = vmatpush3.bf16.msra.mxu1 %v2525_v27 }
  0x65   : > { %2363 = vmatprep.subr.bf16.mxu1 %v2690_v1 }
  0x68   : > { %2364 = vmatpush3.bf16.msra.mxu1 %v2526_v28 }
  0x69   : > { %2409 = vmatprep.subr.bf16.mxu1 %v2690_v1 }
 0x129   : > { %v1063_v7 = vpop.f32.mrb[0].mxu0 }
 0x12a   : > { %v1064_v8 = vadd.f32 %v2228_v6, %v1063_v7  ;;  %v2347_v9 = vpop.f32.mrb[1].mxu0  ;;  %v2528_v7 = vld [vmem:[%s2754_s19 + $0x8] sm:$0xff]  }
 0x12b   : > { %v1066_v10 = vpop.f32.mrb[2].mxu0  ;;  %v2530_v9 = vld [vmem:[%s2754_s19 + $0x18] sm:$0xff]  }
 0x12c   : > { %1070 = vadd.xlane.f32.xlu0 %v1064_v8  ;;  %v2348_v11 = vpop.f32.mrb[3].mxu0  ;;  %v1067_v12 = vadd.f32 %v2228_v6, %v1066_v10  ;;  %v2527_v6 = vld [vmem:[%s2754_s19] sm:$0xff]  }
 0x12d   : > { %2370 = vmatpush3.bf16.msra.mxu0 %v2527_v6 }
 0x12e   : > { %2371 = vmatprep.subr.bf16.mxu0 %v2690_v1 }
 0x130   : > { %1072 = vadd.xlane.f32.xlu0 %v1067_v12 }
 0x131   : > { %2372 = vmatpush3.bf16.msra.mxu0 %v2528_v7 }
 0x132   : > { %2373 = vmatprep.subr.bf16.mxu0 %v2690_v1 }
 0x1b9   : > { %v1071_v14 = vpop.xlane.xlu0 %1070 }
 0x1ba   : > { %v1075_v15 = vmul.f32 0.0078125, %v1071_v14 }
 0x1bc   : > { %v1077_v16 = vsub.f32 %v1064_v8, %v1075_v15  ;;  %v2529_v8 = vld [vmem:[%s2754_s19 + $0x10] sm:$0xff]  }
 0x1bd   : > { %v1073_v17 = vpop.xlane.xlu0 %1072  ;;  %2374 = vmatpush3.bf16.msra.mxu0 %v2529_v8 }
 0x1be   : > { %v1076_v18 = vmul.f32 0.0078125, %v1073_v17  ;;  %v1079_v19 = vmul.f32 %v1077_v16, %v1077_v16  ;;  %2375 = vmatprep.subr.bf16.mxu0 %v2690_v1  ;;  %v2243_v17 = vld [vmem:[%s3126_s8] ss:$0 sm:$0xff] }
 0x1c0   : > { %v1078_v20 = vsub.f32 %v1067_v12, %v1076_v18  ;;  %1081 = vadd.xlane.f32.xlu1 %v1079_v19 }
 0x1c1   : > { %2376 = vmatpush3.bf16.msra.mxu0 %v2530_v9 }
 0x1c2   : > { %v1080_v21 = vmul.f32 %v1078_v20, %v1078_v20 }
 0x1c4   : > { %1083 = vadd.xlane.f32.xlu1 %v1080_v21 }
 0x24d   : > { %v1082_v29 = vpop.xlane.xlu1 %1081 }
 0x24e   : > { %v1085_v30 = vmul.f32 0.0078125, %v1082_v29 }
 0x250   : > { %v1087_v31 = vadd.f32 1e-05, %v1085_v30 }
 0x251   : > { %v1084_v32 = vpop.xlane.xlu1 %1083 }
 0x252   : > { %2559 = vrsqrt.f32 %v1087_v31  ;;  %v1086_v33 = vmul.f32 0.0078125, %v1084_v32  ;;  %v2245_v31 = vld [vmem:[%s2759_s24] ss:$0 sm:$0xff] }
 0x254   : > { %v1088_v34 = vadd.f32 1e-05, %v1086_v33 }
 0x256   : > { %2561 = vrsqrt.f32 %v1088_v34 }
 0x25c   : > { %v2560_v35 = vpop.eup %2559 }
 0x25d   : > { %v1091_v37 = vmul.f32 %v2560_v35, %v1077_v16 }
 0x25f   : > { %v1100_v39 = vmul.f32 %v2232_v36, %v1091_v37 }
 0x260   : > { %v2562_v40 = vpop.eup %2561 }
 0x261   : > { %v1092_v41 = vmul.f32 %v2562_v40, %v1078_v20  ;;  %v1109_v42 = vadd.f32 %v2233_v38, %v1100_v39  ;;  %v2244_v20 = vld [vmem:[%s2749_s14] ss:$0 sm:$0xff] }
 0x263   : > { %v1101_v43 = vmul.f32 %v2232_v36, %v1092_v41  ;;  %v1113_v45 = vmul.f32 0.02, %v1109_v42  ;;  %vm1111_vm2 = vcmp.ge.f32.partialorder %v1109_v42, 0.0 }
 0x265   : > { %v1110_v44 = vadd.f32 %v2233_v38, %v1101_v43  ;;  %v1115_v47 = vsel %vm1111_vm2, %v1109_v42, %v1113_v45 }
 0x267   : > { %vm1112_vm3 = vcmp.ge.f32.partialorder %v1110_v44, 0.0  ;;  %v1114_v46 = vmul.f32 0.02, %v1110_v44 }
 0x269   : > { %v1116_v48 = vsel %vm1112_vm3, %v1110_v44, %v1114_v46 }
 0x26a   : > { %v1117_v49 = vpack.c.bf16 %v1116_v48, %v1115_v47 }
 0x26c   : > { %2366 = vmatmul.mubr.bf16.vlgmr.msra.gmra.mrb[0].mxu1 %v1117_v49 }
 0x26d   : > { %2417 = vmatprep.mubr.msk.bf16.mxu1 %vm2691_vm0, %v2690_v1 }
 0x33f   : > { %v1223_v51 = vpop.f32.mrb[0].mxu1 }
 0x340   : > { %v1224_v52 = vadd.f32 %v2234_v50, %v1223_v51  ;;  %v2367_v53 = vpop.f32.mrb[1].mxu1  ;;  %v2531_v51 = vld [vmem:[%s2774_s12] ss:$8 sps:$4 sm:$0xff]  }
 0x341   : > { %v1226_v54 = vpop.f32.mrb[2].mxu1  ;;  %v2536_v53 = vld [vmem:[%s2774_s12 + $0x14] ss:$8 sps:$4 sm:$0xff]  }
 0x342   : > { %v1227_v55 = vadd.f32 %v2234_v50, %v1226_v54  ;;  %v2368_v56 = vpop.f32.mrb[3].mxu1  ;;  %v1231_v57 = vsel %vm1230_vm4, %v1224_v52, 0.0  ;;  %v2533_v50 = vld [vmem:[%s2774_s12 + $0x4] ss:$8 sps:$4 sm:$0xff]   ;;  %v2692_v54 = vmov 0  }
 0x343   : > { %1232 = vadd.xlane.f32.xlu0 %v1231_v57  ;;  %1457 = vmatprep.subr.bf16.mxu0 %v2533_v50 }
 0x344   : > { %v1234_v58 = vsel %vm1230_vm4, %v1227_v55, 0.0 }
 0x345   : > { %1235 = vadd.xlane.f32.xlu1 %v1234_v58 }
 0x3d0   : > { %v1233_v59 = vpop.xlane.xlu0 %1232 }
 0x3d1   : > { %v1238_v60 = vmul.f32 0.015625, %v1233_v59 }
 0x3d2   : > { %v1236_v61 = vpop.xlane.xlu1 %1235 }
 0x3d3   : > { %v1240_v62 = vsub.f32 %v1224_v52, %v1238_v60  ;;  %v1239_v63 = vmul.f32 0.015625, %v1236_v61  ;;  %v2534_v52 = vld [vmem:[%s2774_s12 + $0x10] ss:$8 sps:$4 sm:$0xff]  }
 0x3d5   : > { %v1241_v0 = vsub.f32 %v1227_v55, %v1239_v63  ;;  %v1242_v2 = vmul.f32 %v1240_v62, %v1240_v62 }
 0x3d7   : > { %v1244_v3 = vsel %vm1230_vm4, %v1242_v2, 0.0  ;;  %v1243_v4 = vmul.f32 %v1241_v0, %v1241_v0  ;;  %v2252_v2 = vld [vmem:[%s3127_s6] ss:$0 sm:$0xff] }
 0x3d8   : > { %1245 = vadd.xlane.f32.xlu0 %v1244_v3 }
 0x3d9   : > { %v1247_v5 = vsel %vm1230_vm4, %v1243_v4, 0.0 }
 0x3da   : > { %1248 = vadd.xlane.f32.xlu1 %v1247_v5 }
 0x465   : > { %v1246_v10 = vpop.xlane.xlu0 %1245 }
 0x466   : > { %v1250_v11 = vmul.f32 0.015625, %v1246_v10 }
 0x467   : > { %v1249_v12 = vpop.xlane.xlu1 %1248 }
 0x468   : > { %v1252_v13 = vadd.f32 1e-05, %v1250_v11  ;;  %v1251_v14 = vmul.f32 0.015625, %v1249_v12  ;;  %v2537_v12 = vld [vmem:[%s3128_s10] sm:$0xff]  }
 0x46a   : > { %2563 = vrsqrt.f32 %v1252_v13  ;;  %v1253_v15 = vadd.f32 1e-05, %v1251_v14  ;;  %v2538_v14 = vld [vmem:[%s3128_s10 + $0x8] sm:$0xff]  }
 0x46c   : > { %2565 = vrsqrt.f32 %v1253_v15  ;;  %v2539_v15 = vld [vmem:[%s3128_s10 + $0x10] sm:$0xff]  }
 0x474   : > { %v2564_v16 = vpop.eup %2563 }
 0x475   : > { %v1256_v18 = vmul.f32 %v2564_v16, %v1240_v62  ;;  %v2251_v62 = vld [vmem:[%s2764_s30] ss:$0 sm:$0xff]  ;;  %v2540_v16 = vld [vmem:[%s3128_s10 + $0x18] sm:$0xff]  }
 0x476   : > { %v2566_v19 = vpop.eup %2565 }
 0x477   : > { %v1265_v21 = vmul.f32 %v2243_v17, %v1256_v18  ;;  %v1257_v22 = vmul.f32 %v2566_v19, %v1241_v0  ;;  %v2542_v18 = vld [vmem:[%s3128_s10 + $0x28] sm:$0xff]   ;;  %v2543_v19 = vld [vmem:[%s3128_s10 + $0x30] sm:$0xff]  }
 0x479   : > { %v1274_v23 = vadd.f32 %v2244_v20, %v1265_v21  ;;  %v1266_v24 = vmul.f32 %v2243_v17, %v1257_v22  ;;  %v2541_v17 = vld [vmem:[%s3128_s10 + $0x20] sm:$0xff]   ;;  %v1424_v21 = vlaneseq }
 0x47b   : > { %v1275_v25 = vadd.f32 %v2244_v20, %v1266_v24  ;;  %v1278_v26 = vmul.f32 0.02, %v1274_v23  ;;  %vm1276_vm5 = vcmp.ge.f32.partialorder %v1274_v23, 0.0  ;;  %v2544_v20 = vld [vmem:[%s3128_s10 + $0x38] sm:$0xff]   ;;  %v1425_v22 = vshrl.u32 %v1424_v21, 7 }
 0x47c   : > { %v1422_v24 = vld [vmem:[%s3129_s7] sm:$0x3]  ;;  %s3132_s7 = sshll.u32 %s3149_s18, 3  ;;  %s3136_s18 = sld [smem:[#allocation16_spill]] }
 0x47d   : > { %vm1277_vm6 = vcmp.ge.f32.partialorder %v1275_v25, 0.0  ;;  %v1279_v27 = vmul.f32 0.02, %v1275_v25  ;;  %v1280_v28 = vsel %vm1276_vm5, %v1274_v23, %v1278_v26  ;;  %v1426_v23 = vsub.s32 0, %v1425_v22  ;;  %s988_s6 = scalar_lea.vmem %s3130_s5, %s3132_s7  ;;  %s3133_s5 = sld [smem:[#allocation15_spill]] }
 0x47e   : > { %s3138_s7 = sld [smem:[#allocation17_spill]] }
 0x47f   : > { %v1281_v29 = vsel %vm1277_vm6, %v1275_v25, %v1279_v27  ;;  %v1430_v25 = vsub.s32 1, %v1425_v22  ;;  %v1427_v26 = vrot.slane %v1422_v24, %v1426_v23 }
 0x480   : > { %v1282_v30 = vpack.c.bf16 %v1281_v29, %v1280_v28 }
 0x481   : > { %v1431_v27 = vrot.slane %v1422_v24, %v1430_v25 }
 0x482   : > { %2378 = vmatmul.mubr.msk.bf16.vlgmr.msra.gmra.mrb[4].mxu0 %vm1230_vm4, %v1282_v30 }
 0x483   : > { %1458 = vmatpush1.bf16.msra.mxu0 %v2531_v51  ;;  %1489 = vmatprep.mubr.bf16.mxu0 %v2692_v54 }
 0x484   : > { %1459 = vmatprep.subr.bf16.mxu0 %v2536_v53 }
 0x487   : > { %1460 = vmatpush1.bf16.msra.mxu0 %v2534_v52 }
 0x488   : > { %2381 = vmatprep.subr.bf16.mxu0 %v2690_v1 }
 0x555   : > { %v1359_v32 = vpop.f32.mrb[4].mxu0 }
 0x556   : > { %v1360_v33 = vadd.f32 %v2245_v31, %v1359_v32  ;;  %v2379_v34 = vpop.f32.mrb[5].mxu0 }
 0x557   : > { %v1362_v35 = vpop.f32.mrb[6].mxu0 }
 0x558   : > { %v1363_v36 = vadd.f32 %v2245_v31, %v1362_v35  ;;  %v2380_v37 = vpop.f32.mrb[7].mxu0  ;;  %v1366_v38 = vsel %vm1025_vm1, %v1360_v33, 0.0 }
 0x559   : > { %1367 = vadd.xlane.f32.xlu0 %v1366_v38 }
 0x55a   : > { %v1369_v39 = vsel %vm1025_vm1, %v1363_v36, 0.0 }
 0x55b   : > { %1370 = vadd.xlane.f32.xlu1 %v1369_v39 }
 0x5e6   : > { %v1368_v40 = vpop.xlane.xlu0 %1367 }
 0x5e7   : > { %v1373_v41 = vmul.f32 0.03125, %v1368_v40  ;;  %v1506_v40 = vld [vmem:[%s988_s6] sm:$0xff] }
 0x5e8   : > { %v1371_v42 = vpop.xlane.xlu1 %1370 }
 0x5e9   : > { %v1375_v43 = vsub.f32 %v1360_v33, %v1373_v41  ;;  %v1374_v44 = vmul.f32 0.03125, %v1371_v42  ;;  %v1507_v42 = vld [vmem:[%s988_s6 + $0x8] sm:$0xff]  ;;  %s3135_s6 = sld [smem:[#allocation14_spill]] }
 0x5eb   : > { %v1376_v45 = vsub.f32 %v1363_v36, %v1374_v44  ;;  %v1377_v46 = vmul.f32 %v1375_v43, %v1375_v43 }
 0x5ed   : > { %v1379_v47 = vsel %vm1025_vm1, %v1377_v46, 0.0  ;;  %v1378_v48 = vmul.f32 %v1376_v45, %v1376_v45 }
 0x5ee   : > { %1380 = vadd.xlane.f32.xlu0 %v1379_v47 }
 0x5ef   : > { %v1382_v49 = vsel %vm1025_vm1, %v1378_v48, 0.0 }
 0x5f0   : > { %1383 = vadd.xlane.f32.xlu1 %v1382_v49  ;;  %v2258_v49 = vld [vmem:[%s3131_s1] ss:$0 sm:$0xff]  ;;  %s3137_s1 = sld [smem:[#allocation19_spill]] }
 0x67b   : > { %v1381_v55 = vpop.xlane.xlu0 %1380 }
 0x67c   : > { %v1385_v56 = vmul.f32 0.03125, %v1381_v55 }
 0x67d   : > { %v1384_v57 = vpop.xlane.xlu1 %1383 }
 0x67e   : > { %v1387_v58 = vadd.f32 1e-05, %v1385_v56  ;;  %v1386_v59 = vmul.f32 0.03125, %v1384_v57 }
 0x680   : > { %2567 = vrsqrt.f32 %v1387_v58  ;;  %v1388_v60 = vadd.f32 1e-05, %v1386_v59 }
 0x682   : > { %2569 = vrsqrt.f32 %v1388_v60 }
 0x68a   : > { %v2568_v61 = vpop.eup %2567 }
 0x68b   : > { %v1391_v63 = vmul.f32 %v2568_v61, %v1375_v43 }
 0x68c   : > { %v2570_v0 = vpop.eup %2569 }
 0x68d   : > { %v1400_v3 = vmul.f32 %v2251_v62, %v1391_v63  ;;  %v1392_v4 = vmul.f32 %v2570_v0, %v1376_v45 }
 0x68f   : > { %v1409_v5 = vadd.f32 %v2252_v2, %v1400_v3  ;;  %v1401_v6 = vmul.f32 %v2251_v62, %v1392_v4 }
 0x691   : > { %v1410_v7 = vadd.f32 %v2252_v2, %v1401_v6  ;;  %v1413_v8 = vmul.f32 0.02, %v1409_v5  ;;  %vm1411_vm7 = vcmp.ge.f32.partialorder %v1409_v5, 0.0  ;;  %v2546_v6 = vld [vmem:[%s3133_s5 + $0x8] sm:$0xff]  }
 0x693   : > { %vm1412_vm8 = vcmp.ge.f32.partialorder %v1410_v7, 0.0  ;;  %v1414_v9 = vmul.f32 0.02, %v1410_v7  ;;  %v1415_v10 = vsel %vm1411_vm7, %v1409_v5, %v1413_v8  ;;  %v2545_v5 = vld [vmem:[%s3133_s5] sm:$0xff]  }
 0x695   : > { %v1416_v11 = vsel %vm1412_vm8, %v1410_v7, %v1414_v9 }
 0x696   : > { %v1417_v13 = vpack.c.bf16 %v1416_v11, %v1415_v10 }
 0x698   : > { %2257 = vmatmul.mubr.msk.bf16.vlgmr.msra.gmra.mrb[8].mxu0 %vm1025_vm1, %v1417_v13 }
 0x699   : > { %2382 = vmatpush3.bf16.msra.mxu0 %v2537_v12  ;;  %2397 = vmatprep.mubr.msk.bf16.mxu0 %vm2691_vm0, %v2690_v1 }
 0x69a   : > { %2383 = vmatprep.subr.bf16.mxu0 %v2690_v1 }
 0x69d   : > { %2384 = vmatpush3.bf16.msra.mxu0 %v2538_v14 }
 0x69e   : > { %2385 = vmatprep.subr.bf16.mxu0 %v2690_v1 }
 0x6a1   : > { %2386 = vmatpush3.bf16.msra.mxu0 %v2539_v15 }
 0x6a2   : > { %2387 = vmatprep.subr.bf16.mxu0 %v2690_v1 }
 0x6a5   : > { %2388 = vmatpush3.bf16.msra.mxu0 %v2540_v16 }
 0x6a6   : > { %2389 = vmatprep.subr.bf16.mxu0 %v2690_v1 }
 0x6a9   : > { %2390 = vmatpush3.bf16.msra.mxu0 %v2541_v17  ;;  %v2268_v17 = vld [vmem:[%s3135_s6] ss:$0 sm:$0xff]  ;;  %s3140_s6 = sld [smem:[#allocation20_spill]] }
 0x6aa   : > { %2391 = vmatprep.subr.bf16.mxu0 %v2690_v1 }
 0x6ad   : > { %2392 = vmatpush3.bf16.msra.mxu0 %v2542_v18 }
 0x6ae   : > { %2393 = vmatprep.subr.bf16.mxu0 %v2690_v1 }
 0x6b1   : > { %2394 = vmatpush3.bf16.msra.mxu0 %v2543_v19 }
 0x6b2   : > { %2395 = vmatprep.subr.bf16.mxu0 %v2690_v1 }
 0x6b5   : > { %2396 = vmatpush3.bf16.msra.mxu0 %v2544_v20 }
 0x6b6   : > { %2401 = vmatprep.subr.bf16.mxu0 %v2690_v1 }
 0x76b   : > { %v1491_v28 = vpop.f32.mrb[8].mxu0 }
 0x76c   : > { %v1492_v29 = vadd.f32 %v1491_v28, %v1427_v26  ;;  %v1493_v30 = vpop.f32.mrb[9].mxu0  ;;  %v2269_v28 = vld [vmem:[%s3136_s18] ss:$0 sm:$0xff]  ;;  %s3141_s18 = sld [smem:[#allocation21_spill]] }
 0x76d   : > { %v1494_v31 = vadd.f32 %v1493_v30, %v1431_v27  ;;  %v1495_v32 = vpop.f32.mrb[10].mxu0 }
 0x76e   : > { %1512 = vst [vmem:[%s995_s3] sm:$0xff] %v1492_v29  ;;  %v1496_v33 = vadd.f32 %v1495_v32, %v1427_v26  ;;  %v1497_v34 = vpop.f32.mrb[11].mxu0 }
 0x76f   : > { %v1500_v35 = vmul.f32 0.5, %v1494_v31  ;;  %1514 = vst [vmem:[%s995_s3 + $0x8] sm:$0xff] %v1494_v31  ;;  %v1498_v36 = vadd.f32 %v1497_v34, %v1431_v27 }
 0x770   : > { %1513 = vst [vmem:[%s995_s3 + $0x18] sm:$0xff] %v1496_v33 }
 0x771   : > { %v1502_v37 = vmul.f32 1.442695, %v1500_v35  ;;  %v1501_v38 = vmul.f32 0.5, %v1498_v36  ;;  %1515 = vst [vmem:[%s995_s3 + $0x20] sm:$0xff] %v1498_v36 }
 0x773   : > { %2571 = vpow2.f32 %v1502_v37  ;;  %v1504_v39 = vmul.f32 1.442695, %v1501_v38 }
 0x775   : > { %2573 = vpow2.f32 %v1504_v39 }
 0x77d   : > { %v2572_v41 = vpop.eup %2571 }
 0x77e   : > { %v1508_v43 = vmul.f32 %v2572_v41, %v1506_v40 }
 0x77f   : > { %v2574_v44 = vpop.eup %2573 }
 0x780   : > { %v1509_v45 = vmul.f32 %v2574_v44, %v1507_v42  ;;  %v1510_v46 = vadd.f32 %v1508_v43, %v1492_v29 }
 0x782   : > { %v1511_v47 = vadd.f32 %v1509_v45, %v1496_v33  ;;  %1516 = vst [vmem:[%s995_s3 + $0x10] sm:$0xff] %v1510_v46 }
 0x784   : > { %1517 = vst [vmem:[%s995_s3 + $0x28] sm:$0xff] %v1511_v47  ;;  %v1518_v48 = vpack.c.bf16 %v1511_v47, %v1510_v46  ;;  %s3134_s3 = sld [smem:[#allocation13_spill]]  ;;  %v2547_v47 = vld [vmem:[%s3137_s1] sm:$0xff]  }
 0x785   : > { %2410 = vmatpush3.bf16.msra.mxu1 %v2547_v47 }
 0x786   : > { %2398 = vmatmul.mubr.bf16.vlgmr.msra.gmra.mrb[12].mxu0 %v1518_v48  ;;  %2411 = vmatprep.subr.bf16.mxu1 %v2690_v1  ;;  %v2548_v48 = vld [vmem:[%s3137_s1 + $0x8] sm:$0xff]  }
 0x787   : > { %2405 = vmatprep.mubr.msk.bf16.mxu0 %vm2691_vm0, %v2690_v1  ;;  %2402 = vmatpush3.bf16.msra.mxu0 %v2545_v5 }
 0x788   : > { %2403 = vmatprep.subr.bf16.mxu0 %v2690_v1 }
 0x789   : > { %2412 = vmatpush3.bf16.msra.mxu1 %v2548_v48 }
 0x78a   : > { %v2267_v14 = vld [vmem:[%s3134_s3] ss:$0 sm:$0xff]  ;;  %2413 = vmatprep.subr.bf16.mxu1 %v2690_v1  ;;  %s3139_s3 = sld [smem:[#allocation18_spill]] }
 0x78b   : > { %2404 = vmatpush3.bf16.msra.mxu0 %v2546_v6 }
 0x859   : > { %v1624_v50 = vpop.f32.mrb[12].mxu0 }
 0x85a   : > { %v1625_v51 = vadd.f32 %v2258_v49, %v1624_v50  ;;  %v2399_v52 = vpop.f32.mrb[13].mxu0  ;;  %v2550_v50 = vld [vmem:[%s3137_s1 + $0x18] sm:$0xff]  }
 0x85b   : > { %v1627_v53 = vpop.f32.mrb[14].mxu0 }
 0x85c   : > { %v1628_v54 = vadd.f32 %v2258_v49, %v1627_v53  ;;  %v2400_v55 = vpop.f32.mrb[15].mxu0  ;;  %v1631_v56 = vsel %vm1025_vm1, %v1625_v51, 0.0  ;;  %v2549_v49 = vld [vmem:[%s3137_s1 + $0x10] sm:$0xff]  }
 0x85d   : > { %1632 = vadd.xlane.f32.xlu0 %v1631_v56  ;;  %2414 = vmatpush3.bf16.msra.mxu1 %v2549_v49 }
 0x85e   : > { %v1634_v57 = vsel %vm1025_vm1, %v1628_v54, 0.0  ;;  %2415 = vmatprep.subr.bf16.mxu1 %v2690_v1 }
 0x85f   : > { %1635 = vadd.xlane.f32.xlu1 %v1634_v57 }
 0x861   : > { %2416 = vmatpush3.bf16.msra.mxu1 %v2550_v50 }
 0x862   : > { %2421 = vmatprep.subr.bf16.mxu1 %v2690_v1 }
 0x8ea   : > { %v1633_v58 = vpop.xlane.xlu0 %1632 }
 0x8eb   : > { %v1637_v59 = vmul.f32 0.03125, %v1633_v58  ;;  %v2273_v58 = vld [vmem:[%s3138_s7] ss:$0 sm:$0xff]  ;;  %s3142_s7 = sld [smem:[#allocation22_spill]] }
 0x8ec   : > { %v1636_v60 = vpop.xlane.xlu1 %1635 }
 0x8ed   : > { %v1639_v61 = vsub.f32 %v1625_v51, %v1637_v59  ;;  %v1638_v62 = vmul.f32 0.03125, %v1636_v60 }
 0x8ef   : > { %v1640_v63 = vsub.f32 %v1628_v54, %v1638_v62  ;;  %v1641_v0 = vmul.f32 %v1639_v61, %v1639_v61 }
 0x8f1   : > { %v1643_v2 = vsel %vm1025_vm1, %v1641_v0, 0.0  ;;  %v1642_v3 = vmul.f32 %v1640_v63, %v1640_v63 }
 0x8f2   : > { %1644 = vadd.xlane.f32.xlu0 %v1643_v2 }
 0x8f3   : > { %v1646_v4 = vsel %vm1025_vm1, %v1642_v3, 0.0 }
 0x8f4   : > { %1647 = vadd.xlane.f32.xlu1 %v1646_v4 }
 0x97f   : > { %v1645_v7 = vpop.xlane.xlu0 %1644 }
 0x980   : > { %v1649_v8 = vmul.f32 0.03125, %v1645_v7 }
 0x981   : > { %v1648_v9 = vpop.xlane.xlu1 %1647 }
 0x982   : > { %v1651_v10 = vadd.f32 1e-05, %v1649_v8  ;;  %v1650_v11 = vmul.f32 0.03125, %v1648_v9  ;;  %v2275_v9 = vld [vmem:[%s3140_s6] ss:$0 sm:$0xff] }
 0x984   : > { %2575 = vrsqrt.f32 %v1651_v10  ;;  %v1652_v12 = vadd.f32 1e-05, %v1650_v11 }
 0x986   : > { %2577 = vrsqrt.f32 %v1652_v12 }
 0x98e   : > { %v2576_v13 = vpop.eup %2575 }
 0x98f   : > { %v1655_v15 = vmul.f32 %v2576_v13, %v1639_v61  ;;  %v2274_v61 = vld [vmem:[%s3139_s3] ss:$0 sm:$0xff]  ;;  %s975_s3 = sand.u32 1, %s2649_s23  }
 0x990   : > { %v2578_v16 = vpop.eup %2577  ;;  %s2221_s6 = sshll.u32 %s975_s3, 4  ;;  %s3059_s5 = scalar_lea.sflag [#allocation3], %s975_s3 }
 0x991   : > { %v1664_v18 = vmul.f32 %v2267_v14, %v1655_v15  ;;  %v1656_v19 = vmul.f32 %v2578_v16, %v1640_v63  ;;  %v2551_v16 = vld [vmem:[%s2844_s27] sm:$0xff]  }
 0x993   : > { %v1673_v20 = vadd.f32 %v2268_v17, %v1664_v18  ;;  %v1665_v21 = vmul.f32 %v2267_v14, %v1656_v19 }
 0x995   : > { %v1674_v22 = vadd.f32 %v2268_v17, %v1665_v21  ;;  %v1677_v23 = vmul.f32 0.02, %v1673_v20  ;;  %vm1675_vm9 = vcmp.ge.f32.partialorder %v1673_v20, 0.0 }
 0x997   : > { %vm1676_vm10 = vcmp.ge.f32.partialorder %v1674_v22, 0.0  ;;  %v1678_v24 = vmul.f32 0.02, %v1674_v22  ;;  %v1679_v25 = vsel %vm1675_vm9, %v1673_v20, %v1677_v23 }
 0x999   : > { %v1680_v26 = vsel %vm1676_vm10, %v1674_v22, %v1678_v24 }
 0x99a   : > { %v1681_v27 = vpack.c.bf16 %v1680_v26, %v1679_v25  ;;  %v2552_v25 = vld [vmem:[%s2844_s27 + $0x8] sm:$0xff]   ;;  %v2553_v26 = vld [vmem:[%s2844_s27 + $0x10] sm:$0xff]  }
 0x99c   : > { %2406 = vmatmul.mubr.msk.bf16.vlgmr.msra.gmra.mrb[16].mxu0 %vm1025_vm1, %v1681_v27  ;;  %v2554_v27 = vld [vmem:[%s2844_s27 + $0x18] sm:$0xff]  }
 0xa6f   : > { %v1742_v29 = vpop.f32.mrb[16].mxu0 }
 0xa70   : > { %v1743_v30 = vadd.f32 %v2269_v28, %v1742_v29  ;;  %v2407_v31 = vpop.f32.mrb[17].mxu0  ;;  %v2556_v29 = vld [vmem:[%s2844_s27 + $0x28] sm:$0xff]  }
 0xa71   : > { %v1745_v32 = vpop.f32.mrb[18].mxu0  ;;  %v2558_v31 = vld [vmem:[%s2844_s27 + $0x38] sm:$0xff]  }
 0xa72   : > { %v1746_v33 = vadd.f32 %v2269_v28, %v1745_v32  ;;  %v2408_v34 = vpop.f32.mrb[19].mxu0  ;;  %v1749_v35 = vsel %vm1230_vm4, %v1743_v30, 0.0  ;;  %v2555_v28 = vld [vmem:[%s2844_s27 + $0x20] sm:$0xff]  }
 0xa73   : > { %1750 = vadd.xlane.f32.xlu0 %v1749_v35 }
 0xa74   : > { %v1752_v36 = vsel %vm1230_vm4, %v1746_v33, 0.0 }
 0xa75   : > { %1753 = vadd.xlane.f32.xlu1 %v1752_v36 }
 0xb00   : > { %v1751_v37 = vpop.xlane.xlu0 %1750 }
 0xb01   : > { %v1755_v38 = vmul.f32 0.015625, %v1751_v37 }
 0xb02   : > { %v1754_v39 = vpop.xlane.xlu1 %1753 }
 0xb03   : > { %v1757_v40 = vsub.f32 %v1743_v30, %v1755_v38  ;;  %v1756_v41 = vmul.f32 0.015625, %v1754_v39  ;;  %v2557_v30 = vld [vmem:[%s2844_s27 + $0x30] sm:$0xff]   ;;  %v2281_v39 = vld [vmem:[%s3141_s18] ss:$0 sm:$0xff]  ;;  %s2297_s18 = sshll.u32 %s2882_s0, 8  ;;  %s2693_s0 = smov [#allocation2]  }
 0xb05   : > { %v1758_v42 = vsub.f32 %v1746_v33, %v1756_v41  ;;  %v1759_v43 = vmul.f32 %v1757_v40, %v1757_v40 }
 0xb07   : > { %v1761_v44 = vsel %vm1230_vm4, %v1759_v43, 0.0  ;;  %v1760_v45 = vmul.f32 %v1758_v42, %v1758_v42 }
 0xb08   : > { %1762 = vadd.xlane.f32.xlu0 %v1761_v44 }
 0xb09   : > { %v1764_v46 = vsel %vm1230_vm4, %v1760_v45, 0.0 }
 0xb0a   : > { %1765 = vadd.xlane.f32.xlu1 %v1764_v46 }
 0xb95   : > { %v1763_v51 = vpop.xlane.xlu0 %1762 }
 0xb96   : > { %v1767_v52 = vmul.f32 0.015625, %v1763_v51 }
 0xb97   : > { %v1766_v53 = vpop.xlane.xlu1 %1765 }
 0xb98   : > { %v1769_v54 = vadd.f32 1e-05, %v1767_v52  ;;  %v1768_v55 = vmul.f32 0.015625, %v1766_v53  ;;  %v2283_v52 = vld [vmem:[%s3143_s4] ss:$0 sm:$0xff]  ;;  %s3055_s4 = scalar_lea.hbm %s2859_s20, %s2297_s18 }
 0xb9a   : > { %2579 = vrsqrt.f32 %v1769_v54  ;;  %v1770_v56 = vadd.f32 1e-05, %v1768_v55 }
 0xb9c   : > { %2581 = vrsqrt.f32 %v1770_v56 }
 0xba4   : > { %v2580_v57 = vpop.eup %2579 }
 0xba5   : > { %v1773_v59 = vmul.f32 %v2580_v57, %v1757_v40 }
 0xba6   : > { %v2582_v60 = vpop.eup %2581 }
 0xba7   : > { %v1782_v62 = vmul.f32 %v2273_v58, %v1773_v59  ;;  %v1774_v63 = vmul.f32 %v2582_v60, %v1758_v42  ;;  %v2282_v42 = vld [vmem:[%s3142_s7] ss:$0 sm:$0xff]  ;;  %s977_s7 = scalar_lea.vmem [#allocation2], %s2221_s6  ;;  %s2599_s6 = sshll.u32 %s2693_s0, 4  ;;  %s2600_s6 = int_to_ptr.vmem [resolvable:$false] %s2599_s6 }
 0xba8   : > { %s2086_s1 = sshll.u32 %s977_s7, 4  ;;  %s2601_s18 = scalar_lea.vmem %s2600_s6, 512  ;;  %s3057_s1 = int_to_ptr.vmem [resolvable:$true] %s2086_s1 }
 0xba9   : > { %v1791_v0 = vadd.f32 %v2274_v61, %v1782_v62  ;;  %v1783_v2 = vmul.f32 %v2273_v58, %v1774_v63  ;;  %s2595_s8 = scalar_lea.vmem %s3057_s1, 256  ;;  %p2602_p0 = scmp.lt.s32.totalorder %s3057_s1, %s2600_s6 }
 0xbaa   : > { %p2596_p11 = scmp.ne.s32.totalorder %s3057_s1, %s2595_s8  ;;  %p2603_p1 = scmp.lt.s32.totalorder %s2601_s18, %s2595_s8 }
 0xbab   : > { %v1792_v3 = vadd.f32 %v2274_v61, %v1783_v2  ;;  %v1795_v4 = vmul.f32 0.02, %v1791_v0  ;;  %vm1793_vm11 = vcmp.ge.f32.partialorder %v1791_v0, 0.0 }
 0xbac   : > { %p2597_p12 = pnand %p2596_p11, %p2899_p5  ;;  %p2604_p2 = por %p2603_p1, %p2602_p0 }
 0xbad   : > { %vm1794_vm12 = vcmp.ge.f32.partialorder %v1792_v3, 0.0  ;;  %v1796_v5 = vmul.f32 0.02, %v1792_v3  ;;  %v1797_v6 = vsel %vm1793_vm11, %v1791_v0, %v1795_v4 }
 0xbae   : > { %p2598_p13 = pneg %p2597_p12 }
 0xbaf   : > { %v1798_v7 = vsel %vm1794_vm12, %v1792_v3, %v1796_v5 }
 0xbb0   : > { %v1799_v8 = vpack.c.bf16 %v1798_v7, %v1797_v6  ;;  %p2605_p3 = pnand %p2604_p2, %p2598_p13 }
 0xbb2   : > { %2418 = vmatmul.mubr.msk.bf16.vlgmr.msra.gmra.mrb[4].mxu1 %vm1230_vm4, %v1799_v8 }
 0xbb3   : > { %2437 = vmatprep.mubr.msk.bf16.mxu1 %vm2691_vm0, %v2690_v1  ;;  %2422 = vmatpush3.bf16.msra.mxu1 %v2551_v16 }
 0xbb4   : > { %2423 = vmatprep.subr.bf16.mxu1 %v2690_v1 }
 0xbb7   : > { %2424 = vmatpush3.bf16.msra.mxu1 %v2552_v25 }
 0xbb8   : > { %2425 = vmatprep.subr.bf16.mxu1 %v2690_v1 }
 0xbbb   : > { %2426 = vmatpush3.bf16.msra.mxu1 %v2553_v26 }
 0xbbc   : > { %2427 = vmatprep.subr.bf16.mxu1 %v2690_v1 }
 0xbbf   : > { %2428 = vmatpush3.bf16.msra.mxu1 %v2554_v27 }
 0xbc0   : > { %2429 = vmatprep.subr.bf16.mxu1 %v2690_v1 }
 0xbc3   : > { %2430 = vmatpush3.bf16.msra.mxu1 %v2555_v28 }
 0xbc4   : > { %2431 = vmatprep.subr.bf16.mxu1 %v2690_v1 }
 0xbc7   : > { %2432 = vmatpush3.bf16.msra.mxu1 %v2556_v29 }
 0xbc8   : > { %2433 = vmatprep.subr.bf16.mxu1 %v2690_v1 }
 0xbcb   : > { %2434 = vmatpush3.bf16.msra.mxu1 %v2557_v30 }
 0xbcc   : > { %2435 = vmatprep.subr.bf16.mxu1 %v2690_v1 }
 0xbcf   : > { %2436 = vmatpush3.bf16.msra.mxu1 %v2558_v31 }
 0xc85   : > { %v1876_v10 = vpop.f32.mrb[4].mxu1 }
 0xc86   : > { %v1877_v11 = vadd.f32 %v2275_v9, %v1876_v10  ;;  %v2419_v12 = vpop.f32.mrb[5].mxu1 }
 0xc87   : > { %v1879_v13 = vpop.f32.mrb[6].mxu1 }
 0xc88   : > { %v1880_v14 = vadd.f32 %v2275_v9, %v1879_v13  ;;  %1883 = vadd.xlane.f32.xlu0 %v1877_v11  ;;  %v2420_v15 = vpop.f32.mrb[7].mxu1 }
 0xc8a   : > { %1885 = vadd.xlane.f32.xlu1 %v1880_v14 }
 0xd15   : > { %v1884_v17 = vpop.xlane.xlu0 %1883 }
 0xd16   : > { %v1887_v18 = vmul.f32 0.0078125, %v1884_v17 }
 0xd17   : > { %v1886_v19 = vpop.xlane.xlu1 %1885 }
 0xd18   : > { %v1889_v20 = vsub.f32 %v1877_v11, %v1887_v18  ;;  %v1888_v21 = vmul.f32 0.0078125, %v1886_v19 }
 0xd1a   : > { %v1890_v22 = vsub.f32 %v1880_v14, %v1888_v21  ;;  %v1891_v23 = vmul.f32 %v1889_v20, %v1889_v20 }
 0xd1c   : > { %1893 = vadd.xlane.f32.xlu0 %v1891_v23  ;;  %v1892_v24 = vmul.f32 %v1890_v22, %v1890_v22 }
 0xd1e   : > { %1895 = vadd.xlane.f32.xlu1 %v1892_v24 }
 0xda9   : > { %v1894_v32 = vpop.xlane.xlu0 %1893 }
 0xdaa   : > { %v1897_v33 = vmul.f32 0.0078125, %v1894_v32 }
 0xdab   : > { %v1896_v34 = vpop.xlane.xlu1 %1895 }
 0xdac   : > { %v1899_v35 = vadd.f32 1e-05, %v1897_v33  ;;  %v1898_v36 = vmul.f32 0.0078125, %v1896_v34 }
 0xdae   : > { %2583 = vrsqrt.f32 %v1899_v35  ;;  %v1900_v37 = vadd.f32 1e-05, %v1898_v36 }
 0xdb0   : > { %2585 = vrsqrt.f32 %v1900_v37 }
 0xdb8   : > { %v2584_v38 = vpop.eup %2583 }
 0xdb9   : > { %v1903_v40 = vmul.f32 %v2584_v38, %v1889_v20 }
 0xdba   : > { %v2586_v41 = vpop.eup %2585 }
 0xdbb   : > { %v1912_v43 = vmul.f32 %v2281_v39, %v1903_v40  ;;  %v1904_v44 = vmul.f32 %v2586_v41, %v1890_v22 }
 0xdbd   : > { %v1913_v45 = vmul.f32 %v2281_v39, %v1904_v44  ;;  %v1921_v46 = vadd.f32 %v2282_v42, %v1912_v43 }
 0xdbf   : > { %v1922_v1 = vadd.f32 %v2282_v42, %v1913_v45  ;;  %v1925_v47 = vmul.f32 0.02, %v1921_v46  ;;  %vm1923_vm13 = vcmp.ge.f32.partialorder %v1921_v46, 0.0 }
 0xdc1   : > { %vm1924_vm14 = vcmp.ge.f32.partialorder %v1922_v1, 0.0  ;;  %v1926_v48 = vmul.f32 0.02, %v1922_v1  ;;  %v1927_v49 = vsel %vm1923_vm13, %v1921_v46, %v1925_v47 }
 0xdc3   : > { %v1928_v50 = vsel %vm1924_vm14, %v1922_v1, %v1926_v48 }
 0xdc4   : > { %v1929_v51 = vpack.c.bf16 %v1928_v50, %v1927_v49 }
 0xdc6   : > { %2438 = vmatmul.mubr.bf16.vlgmr.msra.gmra.mrb[8].mxu1 %v1929_v51 }
 0xe99   : > { %v2035_v53 = vpop.f32.mrb[8].mxu1 }
 0xe9a   : > { %v2036_v54 = vadd.f32 %v2283_v52, %v2035_v53  ;;  %v2439_v55 = vpop.f32.mrb[9].mxu1 }
 0xe9b   : > { %v2038_v56 = vpop.f32.mrb[10].mxu1 }
 0xe9c   : > { %v2039_v57 = vadd.f32 %v2283_v52, %v2038_v56  ;;  %2042 = vmax.xlane.f32.xlu0 %v2036_v54  ;;  %v2440_v58 = vpop.f32.mrb[11].mxu1 }
 0xe9e   : > { %2044 = vmax.xlane.f32.xlu1 %v2039_v57 }
 0xf29   : > { %v2043_v59 = vpop.xlane.xlu0 %2042 }
 0xf2a   : > { %v2046_v60 = vsub.f32 %v2036_v54, %v2043_v59 }
 0xf2b   : > { %v2045_v61 = vpop.xlane.xlu1 %2044 }
 0xf2c   : > { %v2048_v62 = vmul.f32 1.442695, %v2046_v60  ;;  %v2047_v63 = vsub.f32 %v2039_v57, %v2045_v61 }
 0xf2e   : > { %2587 = vpow2.f32 %v2048_v62  ;;  %v2050_v0 = vmul.f32 1.442695, %v2047_v63 }
 0xf30   : > { %2589 = vpow2.f32 %v2050_v0 }
 0xf38   : > { %v2588_v2 = vpop.eup %2587 }
 0xf39   : > { %2052 = vadd.xlane.f32.xlu0 %v2588_v2 }
 0xf3a   : > { %v2590_v3 = vpop.eup %2589 }
 0xf3b   : > { %2054 = vadd.xlane.f32.xlu1 %v2590_v3 }
 0xfc6   : > { %v2053_v4 = vpop.xlane.xlu0 %2052 }
 0xfc7   : > { %2591 = vrcp.f32 %v2053_v4 }
 0xfc8   : > { %v2055_v5 = vpop.xlane.xlu1 %2054 }
 0xfc9   : > { %2593 = vrcp.f32 %v2055_v5 }
 0xfd1   : > { %v2592_v6 = vpop.eup %2591 }
 0xfd2   : > { %v2057_v7 = vmul.f32 %v2592_v6, %v2588_v2 }
 0xfd3   : > { %v2594_v8 = vpop.eup %2593 }
 0xfd4   : > { %v2059_v9 = vmul.f32 %v2594_v8, %v2590_v3  ;;  %2060 = vst [vmem:[%s977_s7] sm:$0xff] %v2057_v7 }
 0xfd6   : > { %2061 = vst [vmem:[%s977_s7 + $0x8] sm:$0xff] %v2059_v9 }
 0xfd7   : > { %2608 = shalt.err (!%p2605_p3)
}
 0xfd8   : > { %s2609_s3 = scalar_lea.hbm %s3055_s4, 256  ;;  %s2613_s7 = scalar_lea.hbm %s2859_s20, 512 }
 0xfd9   : > { %p2610_p4 = scmp.ne.s32.totalorder %s3055_s4, %s2609_s3  ;;  %p2614_p9 = scmp.lt.u32.totalorder %s3055_s4, %s2859_s20 }
 0xfda   : > { %p2615_p10 = scmp.lt.u32.totalorder %s2613_s7, %s2609_s3  ;;  %p2617_p12 = scmp.lt.u32.totalorder %s2609_s3, %s3055_s4 }
 0xfdb   : > { %p2611_p7 = pnand %p2610_p4, %p2899_p5 }
 0xfdc   : > { %p2616_p11 = por %p2615_p10, %p2614_p9 }
 0xfdd   : > { %p2612_p8 = pneg %p2611_p7 }
 0xfde   : > { %p2618_p0 = por %p2617_p12, %p2616_p11 }
 0xfe0   : > { %p2619_p13 = pnand %p2618_p0, %p2612_p8 }
 0xfe2   : > { %2622 = shalt.err (!%p2619_p13)
}
 0xfe3   : > { %s2694_s8 = smov 128   ;;  %s2695_s0 = smov 8  }
 0xfe4   : > { %2442 = dma.vmem_to_hbm [thread:$0]  (%p2899_p5), %s3057_s1, 256, %s3055_s4, %s3059_s5, %s2694_s8, %s2694_s8, %s2695_s0  }
 0xfe5 PF: > { %p2448_p1 = scmp.ge.s32.totalorder %s2657_s28, 2  ;;  %s2110_s6 = sand.u32 1, %s2645_s22  }
 0xfe6   : > { %s2111_s18 = scalar_lea.sflag [#allocation3], %s2110_s6 }
 0xfe7   : > { %p2445_p2 = pnand %p2448_p1, %p2903_p6 }
 0xfe9   : > { %2640 = dma.done.wait (!%p2445_p2), %s2111_s18, 256  }
 0xfea   : > { %2642 = vsyncadd (!%p2445_p2), %s2111_s18, 4294967040  ;;  %p74_p3 = scmp.ge.s32.totalorder %s2886_s2, 4   ;;  %s3144_s22 = smov %s2649_s23 }
 0xfeb   : > { %s3145_s23 = smov %s2653_s26  ;;  %s3146_s26 = smov %s2897_s11 }
 0xfec   : > { %s3147_s28 = smov %s2886_s2  ;;  %76 = sbr.rel (!%p74_p3) target bundleno = 62 (0x3e), region = 221 }
 0xff3   :  { %2116 = vsyncpa [#allocation3], 1 }
 0xff4   :  { %2118 = vsyncpa [#allocation3 + $0x1], 1 }

</bundles_post_ra>
